<compile_context>
chip_gen: v5e
topology: v5e:2x2
jax: 0.10.0
libtpu: 0.0.40
codegen_flags: <defaults>
</compile_context>

<pallas_src>
import functools

import jax
import jax.numpy as jnp
from jax.experimental import pallas as pl
from jax.experimental.pallas import tpu as pltpu

EMB_DIM = 320          # fixed by the module: rnn_cell / r_w / r_fc take 320-d input
HID = 10               # LSTMCell hidden size == per-region output size
NGATES = 4 * HID       # 40 (i, f, g, o)


def sequential_reader_kernel(
    emb_ref,      # (R*B, 320) bf16   time-major flattened regional embeddings
    h0_ref,       # (B, 10)  f32      normal(0,1) initial LSTM hidden state
    c0_ref,       # (B, 10)  f32      normal(0,1) initial LSTM cell state
    wx_ref,       # (320, 50) bf16    [W_ih | W_r]  (x -> lstm gates | region gate)
    wh_ref,       # (10, 50)  f32     [W_hh | W_h]  (h -> lstm gates | region gate)
    ball_ref,     # (1, 50)   f32     [b_ih+b_hh | b_r+b_h]   (pre-fused in wrapper)
    mask_ref,     # (B, R*10) f32     inverted-dropout keep/scale mask
    feat_ref,     # (B, F)    f32     batch.feature
    wfcr_ref,     # (R*10, C) f32     fc weight rows acting on flattened r_emb
    wfcf_ref,     # (F, C)    f32     fc weight rows acting on batch.feature
    bfc_ref,      # (1, C)    f32
    out_ref,      # (B, C)    f32
    *, num_regions, batch):

    R, B = num_regions, batch

    # ---- hoisted x-dependent matmuls: one (R*B,320)x(320,50) MXU op --------
    gx_all = (jnp.dot(emb_ref[...], wx_ref[...],
                      preferred_element_type=jnp.float32)
              + ball_ref[...])                                    # (R*B, 50)

    wh = wh_ref[...]                                              # (10, 50)
    h = h0_ref[...]
    c = c0_ref[...]

    ys = []
    gx_prev = None
    # Sequential recurrence over regions (static unroll; R is small and fixed).
    for t in range(R):
        gx = gx_all[t * B:(t + 1) * B, :]                         # (B, 50)
        # One fused h-matmul per region: first 40 cols feed this step's LSTM
        # gates (they use h_{t-1}); last 10 cols are h_{t-1} @ W_h, i.e. the
        # region-gate term of the *previous* step (whose gate uses its new h).
        gh = jnp.dot(h, wh, preferred_element_type=jnp.float32)   # (B, 50)
        if t > 0:
            gate_prev = jax.nn.sigmoid(gx_prev[:, NGATES:] + gh[:, NGATES:])
            ys.append(h * gate_prev)                              # y_{t-1}

        gates = gx[:, :NGATES] + gh[:, :NGATES]                   # (B, 40)
        sig = jax.nn.sigmoid(gates)                               # one EUP pass
        th = jnp.tanh(gates)                                      # one EUP pass
        i_g = sig[:, 0:HID]
        f_g = sig[:, HID:2 * HID]
        g_g = th[:, 2 * HID:3 * HID]
        o_g = sig[:, 3 * HID:4 * HID]
        c = f_g * c + i_g * g_g
        h = o_g * jnp.tanh(c)
        gx_prev = gx

    # Region gate of the final step (needs one last h @ W_h).
    gh_last = jnp.dot(h, wh, preferred_element_type=jnp.float32)
    gate_last = jax.nn.sigmoid(gx_prev[:, NGATES:] + gh_last[:, NGATES:])
    ys.append(h * gate_last)

    # ---- deferred fc: single contraction over the flattened r_emb ----------
    y_flat = jnp.concatenate(ys, axis=1) * mask_ref[...]          # (B, R*10)
    out = (jnp.dot(y_flat, wfcr_ref[...], preferred_element_type=jnp.float32)
           + jnp.dot(feat_ref[...], wfcf_ref[...],
                     preferred_element_type=jnp.float32)
           + bfc_ref[...])
    out_ref[...] = out.astype(out_ref.dtype)


def run_sequential_reader(emb_flat, h0, c0, wx, wh, ball, mask,
                          feat, wfcr, wfcf, bfc):
    RB = emb_flat.shape[0]
    B = h0.shape[0]
    R = RB // B
    C = bfc.shape[1]
    kern = functools.partial(sequential_reader_kernel, num_regions=R, batch=B)
    vmem = pl.BlockSpec(memory_space=pltpu.MemorySpace.VMEM)
    inputs = (emb_flat, h0, c0, wx, wh, ball, mask, feat, wfcr, wfcf, bfc)
    return pl.pallas_call(
        kern,
        out_shape=jax.ShapeDtypeStruct((B, C), jnp.float32),
        in_specs=[vmem] * len(inputs),
        out_specs=vmem,
    )(*inputs)


# ----------------------------- glue (plain JAX) ------------------------------
# TODO(synk): s_rcnn / q_rcnn / fc are constructor-injected modules with no
# definition in the reference; s_rcnn / q_rcnn are stood in by deterministic
# mean-pool + linear + relu regional encoders producing (B, regions, 320),
# and fc is taken to be a single Linear(R*10 + F -> C).

def embed_lookup(table, tokens):
    # tokens: (seq, B) int32 -> (seq, B, E); padding row of `table` is zeroed.
    return table[tokens]


def regional_encode(x_bse, w, b, n_regions):
    # x_bse: (B, S, E) -> (B, n_regions, 320)
    B, S, E = x_bse.shape
    per = S // n_regions
    x = x_bse[:, :per * n_regions, :].reshape(B, n_regions, per, E).mean(axis=2)
    return jax.nn.relu(jnp.einsum("bre,eo->bro", x, w) + b)


def compute_regional_emb(params, src_tokens, question_tokens,
                         q_regions, s_regions):
    s_embs = embed_lookup(params["embed"], src_tokens)             # (Ss, B, E)
    q_embs = embed_lookup(params["embed"], question_tokens[:36])   # (Sq<=36, B, E)
    s_r = regional_encode(jnp.transpose(s_embs, (1, 0, 2)),
                          params["s_rcnn_w"], params["s_rcnn_b"], s_regions)
    q_r = regional_encode(jnp.transpose(q_embs, (1, 0, 2)),
                          params["q_rcnn_w"], params["q_rcnn_b"], q_regions)
    return jnp.concatenate([q_r, s_r], axis=1)                     # (B, R, 320)


@functools.partial(jax.jit,
                   static_argnames=("q_regions", "s_regions", "dropout_rate"))
def sequential_reader_forward(params, src_tokens, question_tokens, feature,
                              h0, c0, drop_key, *,
                              q_regions, s_regions, dropout_rate):
    """Whole forward (glue + Pallas kernel) under one jit."""
    r_emb = compute_regional_emb(params, src_tokens, question_tokens,
                                 q_regions, s_regions)             # (B, R, 320)
    B, R, _ = r_emb.shape
    # Time-major, flattened, bf16 inputs for the hoisted MXU matmul
    # (f32 accumulate is kept via preferred_element_type inside the kernel).
    emb_flat = (jnp.transpose(r_emb, (1, 0, 2))
                .reshape(R * B, EMB_DIM).astype(jnp.bfloat16))

    # Pre-fused weights / biases (wrapper side — never recomputed in-kernel).
    wx = jnp.concatenate([params["wih"], params["rw"]], axis=1).astype(jnp.bfloat16)
    wh = jnp.concatenate([params["whh"], params["hw"]], axis=1)    # (10, 50) f32
    ball = jnp.concatenate([params["bih"] + params["bhh"],
                            params["rb"] + params["hb"]], axis=1)  # (1, 50)
    wfc = params["wfc"]                                            # (R*10+F, C)
    wfcr, wfcf = wfc[:R * HID, :], wfc[R * HID:, :]

    # Inverted-dropout mask precomputed in plain JAX (fresh key each call).
    if dropout_rate > 0.0:
        keep = jax.random.bernoulli(drop_key, 1.0 - dropout_rate, (B, R * HID))
        mask = keep.astype(jnp.float32) / (1.0 - dropout_rate)
    else:
        mask = jnp.ones((B, R * HID), jnp.float32)

    return run_sequential_reader(emb_flat, h0, c0, wx, wh, ball, mask,
                                 feature, wfcr, wfcf, params["bfc"])


# ----------------------------------- main ------------------------------------
if __name__ == "__main__":
    key = jax.random.PRNGKey(0)
    ks = jax.random.split(key, 24)

    V, E = 50, 32          # vocab size, embed_size
    B = 2                  # batch
    S_LEN, Q_LEN_RAW = 24, 40
    Q_REGIONS, S_REGIONS = 4, 4
    R = Q_REGIONS + S_REGIONS          # regions -> r_emb is (B, R, 320)
    FEAT = 16                          # batch.feature dim
    C = 4                              # fc output classes
    PAD_IDX = 1
    DROPOUT = 0.1                      # opt.dropout

    sc = 0.05
    embed_table = sc * jax.random.normal(ks[0], (V, E), jnp.float32)
    embed_table = embed_table.at[PAD_IDX].set(0.0)   # padding_idx row

    params = {
        "embed": embed_table,
        "q_rcnn_w": sc * jax.random.normal(ks[1], (E, EMB_DIM), jnp.float32),
        "q_rcnn_b": sc * jax.random.normal(ks[2], (EMB_DIM,), jnp.float32),
        "s_rcnn_w": sc * jax.random.normal(ks[3], (E, EMB_DIM), jnp.float32),
        "s_rcnn_b": sc * jax.random.normal(ks[4], (EMB_DIM,), jnp.float32),
        # nn.LSTMCell(320, 10): gate order [i, f, g, o]
        "wih": sc * jax.random.normal(ks[5], (EMB_DIM, 4 * HID), jnp.float32),
        "bih": sc * jax.random.normal(ks[6], (1, 4 * HID), jnp.float32),
        "whh": sc * jax.random.normal(ks[7], (HID, 4 * HID), jnp.float32),
        "bhh": sc * jax.random.normal(ks[8], (1, 4 * HID), jnp.float32),
        # r_w: Linear(320, 10), h_w: Linear(10, 10)
        "rw": sc * jax.random.normal(ks[9], (EMB_DIM, HID), jnp.float32),
        "rb": sc * jax.random.normal(ks[10], (1, HID), jnp.float32),
        "hw": sc * jax.random.normal(ks[11], (HID, HID), jnp.float32),
        "hb": sc * jax.random.normal(ks[12], (1, HID), jnp.float32),
        # fc: Linear(R*10 + FEAT, C) acting on cat([r_emb_flat, feature], 1)
        "wfc": sc * jax.random.normal(ks[13], (R * HID + FEAT, C), jnp.float32),
        "bfc": sc * jax.random.normal(ks[15], (1, C), jnp.float32),
    }

    src_tokens = jax.random.randint(ks[16], (S_LEN, B), 0, V, jnp.int32)
    question_tokens = jax.random.randint(ks[17], (Q_LEN_RAW, B), 0, V, jnp.int32)
    feature = jax.random.normal(ks[18], (B, FEAT), jnp.float32)
    # h, c = normal(0, 1) initial state (as in the PyTorch forward)
    h0 = jax.random.normal(ks[19], (B, HID), jnp.float32)
    c0 = jax.random.normal(ks[20], (B, HID), jnp.float32)
    drop_key = ks[21]

    out = sequential_reader_forward(
        params, src_tokens, question_tokens, feature, h0, c0, drop_key,
        q_regions=Q_REGIONS, s_regions=S_REGIONS, dropout_rate=DROPOUT)
    out = jax.block_until_ready(out)
    assert out.shape == (B, C) and out.dtype == jnp.float32
    assert bool(jnp.all(jnp.isfinite(out)))
    print("KERNEL_OK")
</pallas_src>

<mosaic_0001>
module attributes {stable_mosaic.version = 11 : i64} {
  func.func @sequential_reader_kernel(%arg0: memref<16x320xbf16, #tpu.memory_space<vmem>>, %arg1: memref<2x10xf32, #tpu.memory_space<vmem>>, %arg2: memref<2x10xf32, #tpu.memory_space<vmem>>, %arg3: memref<320x50xbf16, #tpu.memory_space<vmem>>, %arg4: memref<10x50xf32, #tpu.memory_space<vmem>>, %arg5: memref<1x50xf32, #tpu.memory_space<vmem>>, %arg6: memref<2x80xf32, #tpu.memory_space<vmem>>, %arg7: memref<2x16xf32, #tpu.memory_space<vmem>>, %arg8: memref<80x4xf32, #tpu.memory_space<vmem>>, %arg9: memref<16x4xf32, #tpu.memory_space<vmem>>, %arg10: memref<1x4xf32, #tpu.memory_space<vmem>>, %arg11: memref<2x4xf32, #tpu.memory_space<vmem>>) attributes {dimension_semantics = [], scalar_prefetch = 0 : i64, scratch_operands = 0 : i64, tpu.core_type = #tpu.core_type<tc>} {
    %c0 = arith.constant 0 : index
    %c0_0 = arith.constant 0 : index
    %0 = vector.load %arg0[%c0, %c0_0] : memref<16x320xbf16, #tpu.memory_space<vmem>>, vector<16x320xbf16>
    %c0_1 = arith.constant 0 : index
    %c0_2 = arith.constant 0 : index
    %1 = vector.load %arg3[%c0_1, %c0_2] : memref<320x50xbf16, #tpu.memory_space<vmem>>, vector<320x50xbf16>
    %cst = arith.constant dense<0.000000e+00> : vector<16x50xf32>
    %2 = tpu.matmul %0, %1, %cst {dimension_numbers = #tpu.dot_dimension_numbers<[1], [0], [0], [1], [0, 0, 1, 1], [], []>} : vector<16x320xbf16>, vector<320x50xbf16>, vector<16x50xf32> -> vector<16x50xf32>
    %c0_3 = arith.constant 0 : index
    %c0_4 = arith.constant 0 : index
    %3 = vector.load %arg5[%c0_3, %c0_4] : memref<1x50xf32, #tpu.memory_space<vmem>>, vector<1x50xf32>
    %4 = vector.broadcast %3 : vector<1x50xf32> to vector<16x50xf32>
    %5 = arith.addf %2, %4 : vector<16x50xf32>
    %c0_5 = arith.constant 0 : index
    %c0_6 = arith.constant 0 : index
    %6 = vector.load %arg4[%c0_5, %c0_6] : memref<10x50xf32, #tpu.memory_space<vmem>>, vector<10x50xf32>
    %c0_7 = arith.constant 0 : index
    %c0_8 = arith.constant 0 : index
    %7 = vector.load %arg1[%c0_7, %c0_8] : memref<2x10xf32, #tpu.memory_space<vmem>>, vector<2x10xf32>
    %c0_9 = arith.constant 0 : index
    %c0_10 = arith.constant 0 : index
    %8 = vector.load %arg2[%c0_9, %c0_10] : memref<2x10xf32, #tpu.memory_space<vmem>>, vector<2x10xf32>
    %9 = vector.extract_strided_slice %5 {offsets = [0, 0], sizes = [2, 50], strides = [1, 1]} : vector<16x50xf32> to vector<2x50xf32>
    %cst_11 = arith.constant dense<0.000000e+00> : vector<2x50xf32>
    %10 = tpu.matmul %7, %6, %cst_11 {dimension_numbers = #tpu.dot_dimension_numbers<[1], [0], [0], [1], [0, 0, 1, 1], [], []>} : vector<2x10xf32>, vector<10x50xf32>, vector<2x50xf32> -> vector<2x50xf32>
    %11 = vector.extract_strided_slice %9 {offsets = [0, 0], sizes = [2, 40], strides = [1, 1]} : vector<2x50xf32> to vector<2x40xf32>
    %12 = vector.extract_strided_slice %10 {offsets = [0, 0], sizes = [2, 40], strides = [1, 1]} : vector<2x50xf32> to vector<2x40xf32>
    %13 = arith.addf %11, %12 : vector<2x40xf32>
    %14 = arith.negf %13 : vector<2x40xf32>
    %15 = math.exp %14 : vector<2x40xf32>
    %cst_12 = arith.constant 1.000000e+00 : f32
    %16 = vector.broadcast %cst_12 : f32 to vector<2x40xf32>
    %17 = arith.addf %16, %15 : vector<2x40xf32>
    %18 = arith.divf %16, %17 : vector<2x40xf32>
    %19 = math.tanh %13 : vector<2x40xf32>
    %20 = vector.extract_strided_slice %18 {offsets = [0, 0], sizes = [2, 10], strides = [1, 1]} : vector<2x40xf32> to vector<2x10xf32>
    %21 = vector.extract_strided_slice %18 {offsets = [0, 10], sizes = [2, 10], strides = [1, 1]} : vector<2x40xf32> to vector<2x10xf32>
    %22 = vector.extract_strided_slice %19 {offsets = [0, 20], sizes = [2, 10], strides = [1, 1]} : vector<2x40xf32> to vector<2x10xf32>
    %23 = vector.extract_strided_slice %18 {offsets = [0, 30], sizes = [2, 10], strides = [1, 1]} : vector<2x40xf32> to vector<2x10xf32>
    %24 = arith.mulf %21, %8 : vector<2x10xf32>
    %25 = arith.mulf %20, %22 : vector<2x10xf32>
    %26 = arith.addf %24, %25 : vector<2x10xf32>
    %27 = math.tanh %26 : vector<2x10xf32>
    %28 = arith.mulf %23, %27 : vector<2x10xf32>
    %29 = vector.extract_strided_slice %5 {offsets = [2, 0], sizes = [2, 50], strides = [1, 1]} : vector<16x50xf32> to vector<2x50xf32>
    %cst_13 = arith.constant dense<0.000000e+00> : vector<2x50xf32>
    %30 = tpu.matmul %28, %6, %cst_13 {dimension_numbers = #tpu.dot_dimension_numbers<[1], [0], [0], [1], [0, 0, 1, 1], [], []>} : vector<2x10xf32>, vector<10x50xf32>, vector<2x50xf32> -> vector<2x50xf32>
    %31 = vector.extract_strided_slice %9 {offsets = [0, 40], sizes = [2, 10], strides = [1, 1]} : vector<2x50xf32> to vector<2x10xf32>
    %32 = vector.extract_strided_slice %30 {offsets = [0, 40], sizes = [2, 10], strides = [1, 1]} : vector<2x50xf32> to vector<2x10xf32>
    %33 = arith.addf %31, %32 : vector<2x10xf32>
    %34 = arith.negf %33 : vector<2x10xf32>
    %35 = math.exp %34 : vector<2x10xf32>
    %cst_14 = arith.constant 1.000000e+00 : f32
    %36 = vector.broadcast %cst_14 : f32 to vector<2x10xf32>
    %37 = arith.addf %36, %35 : vector<2x10xf32>
    %38 = arith.divf %36, %37 : vector<2x10xf32>
    %39 = arith.mulf %28, %38 : vector<2x10xf32>
    %40 = vector.extract_strided_slice %29 {offsets = [0, 0], sizes = [2, 40], strides = [1, 1]} : vector<2x50xf32> to vector<2x40xf32>
    %41 = vector.extract_strided_slice %30 {offsets = [0, 0], sizes = [2, 40], strides = [1, 1]} : vector<2x50xf32> to vector<2x40xf32>
    %42 = arith.addf %40, %41 : vector<2x40xf32>
    %43 = arith.negf %42 : vector<2x40xf32>
    %44 = math.exp %43 : vector<2x40xf32>
    %cst_15 = arith.constant 1.000000e+00 : f32
    %45 = vector.broadcast %cst_15 : f32 to vector<2x40xf32>
    %46 = arith.addf %45, %44 : vector<2x40xf32>
    %47 = arith.divf %45, %46 : vector<2x40xf32>
    %48 = math.tanh %42 : vector<2x40xf32>
    %49 = vector.extract_strided_slice %47 {offsets = [0, 0], sizes = [2, 10], strides = [1, 1]} : vector<2x40xf32> to vector<2x10xf32>
    %50 = vector.extract_strided_slice %47 {offsets = [0, 10], sizes = [2, 10], strides = [1, 1]} : vector<2x40xf32> to vector<2x10xf32>
    %51 = vector.extract_strided_slice %48 {offsets = [0, 20], sizes = [2, 10], strides = [1, 1]} : vector<2x40xf32> to vector<2x10xf32>
    %52 = vector.extract_strided_slice %47 {offsets = [0, 30], sizes = [2, 10], strides = [1, 1]} : vector<2x40xf32> to vector<2x10xf32>
    %53 = arith.mulf %50, %26 : vector<2x10xf32>
    %54 = arith.mulf %49, %51 : vector<2x10xf32>
    %55 = arith.addf %53, %54 : vector<2x10xf32>
    %56 = math.tanh %55 : vector<2x10xf32>
    %57 = arith.mulf %52, %56 : vector<2x10xf32>
    %58 = vector.extract_strided_slice %5 {offsets = [4, 0], sizes = [2, 50], strides = [1, 1]} : vector<16x50xf32> to vector<2x50xf32>
    %cst_16 = arith.constant dense<0.000000e+00> : vector<2x50xf32>
    %59 = tpu.matmul %57, %6, %cst_16 {dimension_numbers = #tpu.dot_dimension_numbers<[1], [0], [0], [1], [0, 0, 1, 1], [], []>} : vector<2x10xf32>, vector<10x50xf32>, vector<2x50xf32> -> vector<2x50xf32>
    %60 = vector.extract_strided_slice %29 {offsets = [0, 40], sizes = [2, 10], strides = [1, 1]} : vector<2x50xf32> to vector<2x10xf32>
    %61 = vector.extract_strided_slice %59 {offsets = [0, 40], sizes = [2, 10], strides = [1, 1]} : vector<2x50xf32> to vector<2x10xf32>
    %62 = arith.addf %60, %61 : vector<2x10xf32>
    %63 = arith.negf %62 : vector<2x10xf32>
    %64 = math.exp %63 : vector<2x10xf32>
    %cst_17 = arith.constant 1.000000e+00 : f32
    %65 = vector.broadcast %cst_17 : f32 to vector<2x10xf32>
    %66 = arith.addf %65, %64 : vector<2x10xf32>
    %67 = arith.divf %65, %66 : vector<2x10xf32>
    %68 = arith.mulf %57, %67 : vector<2x10xf32>
    %69 = vector.extract_strided_slice %58 {offsets = [0, 0], sizes = [2, 40], strides = [1, 1]} : vector<2x50xf32> to vector<2x40xf32>
    %70 = vector.extract_strided_slice %59 {offsets = [0, 0], sizes = [2, 40], strides = [1, 1]} : vector<2x50xf32> to vector<2x40xf32>
    %71 = arith.addf %69, %70 : vector<2x40xf32>
    %72 = arith.negf %71 : vector<2x40xf32>
    %73 = math.exp %72 : vector<2x40xf32>
    %cst_18 = arith.constant 1.000000e+00 : f32
    %74 = vector.broadcast %cst_18 : f32 to vector<2x40xf32>
    %75 = arith.addf %74, %73 : vector<2x40xf32>
    %76 = arith.divf %74, %75 : vector<2x40xf32>
    %77 = math.tanh %71 : vector<2x40xf32>
    %78 = vector.extract_strided_slice %76 {offsets = [0, 0], sizes = [2, 10], strides = [1, 1]} : vector<2x40xf32> to vector<2x10xf32>
    %79 = vector.extract_strided_slice %76 {offsets = [0, 10], sizes = [2, 10], strides = [1, 1]} : vector<2x40xf32> to vector<2x10xf32>
    %80 = vector.extract_strided_slice %77 {offsets = [0, 20], sizes = [2, 10], strides = [1, 1]} : vector<2x40xf32> to vector<2x10xf32>
    %81 = vector.extract_strided_slice %76 {offsets = [0, 30], sizes = [2, 10], strides = [1, 1]} : vector<2x40xf32> to vector<2x10xf32>
    %82 = arith.mulf %79, %55 : vector<2x10xf32>
    %83 = arith.mulf %78, %80 : vector<2x10xf32>
    %84 = arith.addf %82, %83 : vector<2x10xf32>
    %85 = math.tanh %84 : vector<2x10xf32>
    %86 = arith.mulf %81, %85 : vector<2x10xf32>
    %87 = vector.extract_strided_slice %5 {offsets = [6, 0], sizes = [2, 50], strides = [1, 1]} : vector<16x50xf32> to vector<2x50xf32>
    %cst_19 = arith.constant dense<0.000000e+00> : vector<2x50xf32>
    %88 = tpu.matmul %86, %6, %cst_19 {dimension_numbers = #tpu.dot_dimension_numbers<[1], [0], [0], [1], [0, 0, 1, 1], [], []>} : vector<2x10xf32>, vector<10x50xf32>, vector<2x50xf32> -> vector<2x50xf32>
    %89 = vector.extract_strided_slice %58 {offsets = [0, 40], sizes = [2, 10], strides = [1, 1]} : vector<2x50xf32> to vector<2x10xf32>
    %90 = vector.extract_strided_slice %88 {offsets = [0, 40], sizes = [2, 10], strides = [1, 1]} : vector<2x50xf32> to vector<2x10xf32>
    %91 = arith.addf %89, %90 : vector<2x10xf32>
    %92 = arith.negf %91 : vector<2x10xf32>
    %93 = math.exp %92 : vector<2x10xf32>
    %cst_20 = arith.constant 1.000000e+00 : f32
    %94 = vector.broadcast %cst_20 : f32 to vector<2x10xf32>
    %95 = arith.addf %94, %93 : vector<2x10xf32>
    %96 = arith.divf %94, %95 : vector<2x10xf32>
    %97 = arith.mulf %86, %96 : vector<2x10xf32>
    %98 = vector.extract_strided_slice %87 {offsets = [0, 0], sizes = [2, 40], strides = [1, 1]} : vector<2x50xf32> to vector<2x40xf32>
    %99 = vector.extract_strided_slice %88 {offsets = [0, 0], sizes = [2, 40], strides = [1, 1]} : vector<2x50xf32> to vector<2x40xf32>
    %100 = arith.addf %98, %99 : vector<2x40xf32>
    %101 = arith.negf %100 : vector<2x40xf32>
    %102 = math.exp %101 : vector<2x40xf32>
    %cst_21 = arith.constant 1.000000e+00 : f32
    %103 = vector.broadcast %cst_21 : f32 to vector<2x40xf32>
    %104 = arith.addf %103, %102 : vector<2x40xf32>
    %105 = arith.divf %103, %104 : vector<2x40xf32>
    %106 = math.tanh %100 : vector<2x40xf32>
    %107 = vector.extract_strided_slice %105 {offsets = [0, 0], sizes = [2, 10], strides = [1, 1]} : vector<2x40xf32> to vector<2x10xf32>
    %108 = vector.extract_strided_slice %105 {offsets = [0, 10], sizes = [2, 10], strides = [1, 1]} : vector<2x40xf32> to vector<2x10xf32>
    %109 = vector.extract_strided_slice %106 {offsets = [0, 20], sizes = [2, 10], strides = [1, 1]} : vector<2x40xf32> to vector<2x10xf32>
    %110 = vector.extract_strided_slice %105 {offsets = [0, 30], sizes = [2, 10], strides = [1, 1]} : vector<2x40xf32> to vector<2x10xf32>
    %111 = arith.mulf %108, %84 : vector<2x10xf32>
    %112 = arith.mulf %107, %109 : vector<2x10xf32>
    %113 = arith.addf %111, %112 : vector<2x10xf32>
    %114 = math.tanh %113 : vector<2x10xf32>
    %115 = arith.mulf %110, %114 : vector<2x10xf32>
    %116 = vector.extract_strided_slice %5 {offsets = [8, 0], sizes = [2, 50], strides = [1, 1]} : vector<16x50xf32> to vector<2x50xf32>
    %cst_22 = arith.constant dense<0.000000e+00> : vector<2x50xf32>
    %117 = tpu.matmul %115, %6, %cst_22 {dimension_numbers = #tpu.dot_dimension_numbers<[1], [0], [0], [1], [0, 0, 1, 1], [], []>} : vector<2x10xf32>, vector<10x50xf32>, vector<2x50xf32> -> vector<2x50xf32>
    %118 = vector.extract_strided_slice %87 {offsets = [0, 40], sizes = [2, 10], strides = [1, 1]} : vector<2x50xf32> to vector<2x10xf32>
    %119 = vector.extract_strided_slice %117 {offsets = [0, 40], sizes = [2, 10], strides = [1, 1]} : vector<2x50xf32> to vector<2x10xf32>
    %120 = arith.addf %118, %119 : vector<2x10xf32>
    %121 = arith.negf %120 : vector<2x10xf32>
    %122 = math.exp %121 : vector<2x10xf32>
    %cst_23 = arith.constant 1.000000e+00 : f32
    %123 = vector.broadcast %cst_23 : f32 to vector<2x10xf32>
    %124 = arith.addf %123, %122 : vector<2x10xf32>
    %125 = arith.divf %123, %124 : vector<2x10xf32>
    %126 = arith.mulf %115, %125 : vector<2x10xf32>
    %127 = vector.extract_strided_slice %116 {offsets = [0, 0], sizes = [2, 40], strides = [1, 1]} : vector<2x50xf32> to vector<2x40xf32>
    %128 = vector.extract_strided_slice %117 {offsets = [0, 0], sizes = [2, 40], strides = [1, 1]} : vector<2x50xf32> to vector<2x40xf32>
    %129 = arith.addf %127, %128 : vector<2x40xf32>
    %130 = arith.negf %129 : vector<2x40xf32>
    %131 = math.exp %130 : vector<2x40xf32>
    %cst_24 = arith.constant 1.000000e+00 : f32
    %132 = vector.broadcast %cst_24 : f32 to vector<2x40xf32>
    %133 = arith.addf %132, %131 : vector<2x40xf32>
    %134 = arith.divf %132, %133 : vector<2x40xf32>
    %135 = math.tanh %129 : vector<2x40xf32>
    %136 = vector.extract_strided_slice %134 {offsets = [0, 0], sizes = [2, 10], strides = [1, 1]} : vector<2x40xf32> to vector<2x10xf32>
    %137 = vector.extract_strided_slice %134 {offsets = [0, 10], sizes = [2, 10], strides = [1, 1]} : vector<2x40xf32> to vector<2x10xf32>
    %138 = vector.extract_strided_slice %135 {offsets = [0, 20], sizes = [2, 10], strides = [1, 1]} : vector<2x40xf32> to vector<2x10xf32>
    %139 = vector.extract_strided_slice %134 {offsets = [0, 30], sizes = [2, 10], strides = [1, 1]} : vector<2x40xf32> to vector<2x10xf32>
    %140 = arith.mulf %137, %113 : vector<2x10xf32>
    %141 = arith.mulf %136, %138 : vector<2x10xf32>
    %142 = arith.addf %140, %141 : vector<2x10xf32>
    %143 = math.tanh %142 : vector<2x10xf32>
    %144 = arith.mulf %139, %143 : vector<2x10xf32>
    %145 = vector.extract_strided_slice %5 {offsets = [10, 0], sizes = [2, 50], strides = [1, 1]} : vector<16x50xf32> to vector<2x50xf32>
    %cst_25 = arith.constant dense<0.000000e+00> : vector<2x50xf32>
    %146 = tpu.matmul %144, %6, %cst_25 {dimension_numbers = #tpu.dot_dimension_numbers<[1], [0], [0], [1], [0, 0, 1, 1], [], []>} : vector<2x10xf32>, vector<10x50xf32>, vector<2x50xf32> -> vector<2x50xf32>
    %147 = vector.extract_strided_slice %116 {offsets = [0, 40], sizes = [2, 10], strides = [1, 1]} : vector<2x50xf32> to vector<2x10xf32>
    %148 = vector.extract_strided_slice %146 {offsets = [0, 40], sizes = [2, 10], strides = [1, 1]} : vector<2x50xf32> to vector<2x10xf32>
    %149 = arith.addf %147, %148 : vector<2x10xf32>
    %150 = arith.negf %149 : vector<2x10xf32>
    %151 = math.exp %150 : vector<2x10xf32>
    %cst_26 = arith.constant 1.000000e+00 : f32
    %152 = vector.broadcast %cst_26 : f32 to vector<2x10xf32>
    %153 = arith.addf %152, %151 : vector<2x10xf32>
    %154 = arith.divf %152, %153 : vector<2x10xf32>
    %155 = arith.mulf %144, %154 : vector<2x10xf32>
    %156 = vector.extract_strided_slice %145 {offsets = [0, 0], sizes = [2, 40], strides = [1, 1]} : vector<2x50xf32> to vector<2x40xf32>
    %157 = vector.extract_strided_slice %146 {offsets = [0, 0], sizes = [2, 40], strides = [1, 1]} : vector<2x50xf32> to vector<2x40xf32>
    %158 = arith.addf %156, %157 : vector<2x40xf32>
    %159 = arith.negf %158 : vector<2x40xf32>
    %160 = math.exp %159 : vector<2x40xf32>
    %cst_27 = arith.constant 1.000000e+00 : f32
    %161 = vector.broadcast %cst_27 : f32 to vector<2x40xf32>
    %162 = arith.addf %161, %160 : vector<2x40xf32>
    %163 = arith.divf %161, %162 : vector<2x40xf32>
    %164 = math.tanh %158 : vector<2x40xf32>
    %165 = vector.extract_strided_slice %163 {offsets = [0, 0], sizes = [2, 10], strides = [1, 1]} : vector<2x40xf32> to vector<2x10xf32>
    %166 = vector.extract_strided_slice %163 {offsets = [0, 10], sizes = [2, 10], strides = [1, 1]} : vector<2x40xf32> to vector<2x10xf32>
    %167 = vector.extract_strided_slice %164 {offsets = [0, 20], sizes = [2, 10], strides = [1, 1]} : vector<2x40xf32> to vector<2x10xf32>
    %168 = vector.extract_strided_slice %163 {offsets = [0, 30], sizes = [2, 10], strides = [1, 1]} : vector<2x40xf32> to vector<2x10xf32>
    %169 = arith.mulf %166, %142 : vector<2x10xf32>
    %170 = arith.mulf %165, %167 : vector<2x10xf32>
    %171 = arith.addf %169, %170 : vector<2x10xf32>
    %172 = math.tanh %171 : vector<2x10xf32>
    %173 = arith.mulf %168, %172 : vector<2x10xf32>
    %174 = vector.extract_strided_slice %5 {offsets = [12, 0], sizes = [2, 50], strides = [1, 1]} : vector<16x50xf32> to vector<2x50xf32>
    %cst_28 = arith.constant dense<0.000000e+00> : vector<2x50xf32>
    %175 = tpu.matmul %173, %6, %cst_28 {dimension_numbers = #tpu.dot_dimension_numbers<[1], [0], [0], [1], [0, 0, 1, 1], [], []>} : vector<2x10xf32>, vector<10x50xf32>, vector<2x50xf32> -> vector<2x50xf32>
    %176 = vector.extract_strided_slice %145 {offsets = [0, 40], sizes = [2, 10], strides = [1, 1]} : vector<2x50xf32> to vector<2x10xf32>
    %177 = vector.extract_strided_slice %175 {offsets = [0, 40], sizes = [2, 10], strides = [1, 1]} : vector<2x50xf32> to vector<2x10xf32>
    %178 = arith.addf %176, %177 : vector<2x10xf32>
    %179 = arith.negf %178 : vector<2x10xf32>
    %180 = math.exp %179 : vector<2x10xf32>
    %cst_29 = arith.constant 1.000000e+00 : f32
    %181 = vector.broadcast %cst_29 : f32 to vector<2x10xf32>
    %182 = arith.addf %181, %180 : vector<2x10xf32>
    %183 = arith.divf %181, %182 : vector<2x10xf32>
    %184 = arith.mulf %173, %183 : vector<2x10xf32>
    %185 = vector.extract_strided_slice %174 {offsets = [0, 0], sizes = [2, 40], strides = [1, 1]} : vector<2x50xf32> to vector<2x40xf32>
    %186 = vector.extract_strided_slice %175 {offsets = [0, 0], sizes = [2, 40], strides = [1, 1]} : vector<2x50xf32> to vector<2x40xf32>
    %187 = arith.addf %185, %186 : vector<2x40xf32>
    %188 = arith.negf %187 : vector<2x40xf32>
    %189 = math.exp %188 : vector<2x40xf32>
    %cst_30 = arith.constant 1.000000e+00 : f32
    %190 = vector.broadcast %cst_30 : f32 to vector<2x40xf32>
    %191 = arith.addf %190, %189 : vector<2x40xf32>
    %192 = arith.divf %190, %191 : vector<2x40xf32>
    %193 = math.tanh %187 : vector<2x40xf32>
    %194 = vector.extract_strided_slice %192 {offsets = [0, 0], sizes = [2, 10], strides = [1, 1]} : vector<2x40xf32> to vector<2x10xf32>
    %195 = vector.extract_strided_slice %192 {offsets = [0, 10], sizes = [2, 10], strides = [1, 1]} : vector<2x40xf32> to vector<2x10xf32>
    %196 = vector.extract_strided_slice %193 {offsets = [0, 20], sizes = [2, 10], strides = [1, 1]} : vector<2x40xf32> to vector<2x10xf32>
    %197 = vector.extract_strided_slice %192 {offsets = [0, 30], sizes = [2, 10], strides = [1, 1]} : vector<2x40xf32> to vector<2x10xf32>
    %198 = arith.mulf %195, %171 : vector<2x10xf32>
    %199 = arith.mulf %194, %196 : vector<2x10xf32>
    %200 = arith.addf %198, %199 : vector<2x10xf32>
    %201 = math.tanh %200 : vector<2x10xf32>
    %202 = arith.mulf %197, %201 : vector<2x10xf32>
    %203 = vector.extract_strided_slice %5 {offsets = [14, 0], sizes = [2, 50], strides = [1, 1]} : vector<16x50xf32> to vector<2x50xf32>
    %cst_31 = arith.constant dense<0.000000e+00> : vector<2x50xf32>
    %204 = tpu.matmul %202, %6, %cst_31 {dimension_numbers = #tpu.dot_dimension_numbers<[1], [0], [0], [1], [0, 0, 1, 1], [], []>} : vector<2x10xf32>, vector<10x50xf32>, vector<2x50xf32> -> vector<2x50xf32>
    %205 = vector.extract_strided_slice %174 {offsets = [0, 40], sizes = [2, 10], strides = [1, 1]} : vector<2x50xf32> to vector<2x10xf32>
    %206 = vector.extract_strided_slice %204 {offsets = [0, 40], sizes = [2, 10], strides = [1, 1]} : vector<2x50xf32> to vector<2x10xf32>
    %207 = arith.addf %205, %206 : vector<2x10xf32>
    %208 = arith.negf %207 : vector<2x10xf32>
    %209 = math.exp %208 : vector<2x10xf32>
    %cst_32 = arith.constant 1.000000e+00 : f32
    %210 = vector.broadcast %cst_32 : f32 to vector<2x10xf32>
    %211 = arith.addf %210, %209 : vector<2x10xf32>
    %212 = arith.divf %210, %211 : vector<2x10xf32>
    %213 = arith.mulf %202, %212 : vector<2x10xf32>
    %214 = vector.extract_strided_slice %203 {offsets = [0, 0], sizes = [2, 40], strides = [1, 1]} : vector<2x50xf32> to vector<2x40xf32>
    %215 = vector.extract_strided_slice %204 {offsets = [0, 0], sizes = [2, 40], strides = [1, 1]} : vector<2x50xf32> to vector<2x40xf32>
    %216 = arith.addf %214, %215 : vector<2x40xf32>
    %217 = arith.negf %216 : vector<2x40xf32>
    %218 = math.exp %217 : vector<2x40xf32>
    %cst_33 = arith.constant 1.000000e+00 : f32
    %219 = vector.broadcast %cst_33 : f32 to vector<2x40xf32>
    %220 = arith.addf %219, %218 : vector<2x40xf32>
    %221 = arith.divf %219, %220 : vector<2x40xf32>
    %222 = math.tanh %216 : vector<2x40xf32>
    %223 = vector.extract_strided_slice %221 {offsets = [0, 0], sizes = [2, 10], strides = [1, 1]} : vector<2x40xf32> to vector<2x10xf32>
    %224 = vector.extract_strided_slice %221 {offsets = [0, 10], sizes = [2, 10], strides = [1, 1]} : vector<2x40xf32> to vector<2x10xf32>
    %225 = vector.extract_strided_slice %222 {offsets = [0, 20], sizes = [2, 10], strides = [1, 1]} : vector<2x40xf32> to vector<2x10xf32>
    %226 = vector.extract_strided_slice %221 {offsets = [0, 30], sizes = [2, 10], strides = [1, 1]} : vector<2x40xf32> to vector<2x10xf32>
    %227 = arith.mulf %224, %200 : vector<2x10xf32>
    %228 = arith.mulf %223, %225 : vector<2x10xf32>
    %229 = arith.addf %227, %228 : vector<2x10xf32>
    %230 = math.tanh %229 : vector<2x10xf32>
    %231 = arith.mulf %226, %230 : vector<2x10xf32>
    %cst_34 = arith.constant dense<0.000000e+00> : vector<2x50xf32>
    %232 = tpu.matmul %231, %6, %cst_34 {dimension_numbers = #tpu.dot_dimension_numbers<[1], [0], [0], [1], [0, 0, 1, 1], [], []>} : vector<2x10xf32>, vector<10x50xf32>, vector<2x50xf32> -> vector<2x50xf32>
    %233 = vector.extract_strided_slice %203 {offsets = [0, 40], sizes = [2, 10], strides = [1, 1]} : vector<2x50xf32> to vector<2x10xf32>
    %234 = vector.extract_strided_slice %232 {offsets = [0, 40], sizes = [2, 10], strides = [1, 1]} : vector<2x50xf32> to vector<2x10xf32>
    %235 = arith.addf %233, %234 : vector<2x10xf32>
    %236 = arith.negf %235 : vector<2x10xf32>
    %237 = math.exp %236 : vector<2x10xf32>
    %cst_35 = arith.constant 1.000000e+00 : f32
    %238 = vector.broadcast %cst_35 : f32 to vector<2x10xf32>
    %239 = arith.addf %238, %237 : vector<2x10xf32>
    %240 = arith.divf %238, %239 : vector<2x10xf32>
    %241 = arith.mulf %231, %240 : vector<2x10xf32>
    %242 = tpu.concatenate %39, %68, %97, %126, %155, %184, %213, %241 in 1 : vector<2x10xf32>, vector<2x10xf32>, vector<2x10xf32>, vector<2x10xf32>, vector<2x10xf32>, vector<2x10xf32>, vector<2x10xf32>, vector<2x10xf32> -> vector<2x80xf32>
    %c0_36 = arith.constant 0 : index
    %c0_37 = arith.constant 0 : index
    %243 = vector.load %arg6[%c0_36, %c0_37] : memref<2x80xf32, #tpu.memory_space<vmem>>, vector<2x80xf32>
    %244 = arith.mulf %242, %243 : vector<2x80xf32>
    %c0_38 = arith.constant 0 : index
    %c0_39 = arith.constant 0 : index
    %245 = vector.load %arg8[%c0_38, %c0_39] : memref<80x4xf32, #tpu.memory_space<vmem>>, vector<80x4xf32>
    %cst_40 = arith.constant dense<0.000000e+00> : vector<2x4xf32>
    %246 = tpu.matmul %244, %245, %cst_40 {dimension_numbers = #tpu.dot_dimension_numbers<[1], [0], [0], [1], [0, 0, 1, 1], [], []>} : vector<2x80xf32>, vector<80x4xf32>, vector<2x4xf32> -> vector<2x4xf32>
    %c0_41 = arith.constant 0 : index
    %c0_42 = arith.constant 0 : index
    %247 = vector.load %arg7[%c0_41, %c0_42] : memref<2x16xf32, #tpu.memory_space<vmem>>, vector<2x16xf32>
    %c0_43 = arith.constant 0 : index
    %c0_44 = arith.constant 0 : index
    %248 = vector.load %arg9[%c0_43, %c0_44] : memref<16x4xf32, #tpu.memory_space<vmem>>, vector<16x4xf32>
    %cst_45 = arith.constant dense<0.000000e+00> : vector<2x4xf32>
    %249 = tpu.matmul %247, %248, %cst_45 {dimension_numbers = #tpu.dot_dimension_numbers<[1], [0], [0], [1], [0, 0, 1, 1], [], []>} : vector<2x16xf32>, vector<16x4xf32>, vector<2x4xf32> -> vector<2x4xf32>
    %250 = arith.addf %246, %249 : vector<2x4xf32>
    %c0_46 = arith.constant 0 : index
    %c0_47 = arith.constant 0 : index
    %251 = vector.load %arg10[%c0_46, %c0_47] : memref<1x4xf32, #tpu.memory_space<vmem>>, vector<1x4xf32>
    %252 = vector.broadcast %251 : vector<1x4xf32> to vector<2x4xf32>
    %253 = arith.addf %250, %252 : vector<2x4xf32>
    %c0_48 = arith.constant 0 : index
    %c0_49 = arith.constant 0 : index
    %254 = vector.load %arg11[%c0_48, %c0_49] : memref<2x4xf32, #tpu.memory_space<vmem>>, vector<2x4xf32>
    tpu.vector_store %arg11[%c0_48, %c0_49], %253 {strides = array<i32>} : memref<2x4xf32, #tpu.memory_space<vmem>>, vector<2x4xf32>,
    return
  }
}

</mosaic_0001>

<bundles_post_ra>
// kernel: sequential_reader_forward.1
= control target key start
LH: loop header
LB: loop body
LE: loop exit
PB: predicated region body
PF: predicated region fallthrough
CT: control target
= control target key end

     0   :  { %vm277_vm0 = vcmask 1041408   ;;  %vm273_vm1 = vcmask 80896   ;;  %s1872_s0 = inlined_call_operand.vmem [shape: bf16[16,320], index: 0, kind: input, shape index: {}]   ;;  %s1873_s1 = inlined_call_operand.vmem [shape: f32[2,10], index: 1, kind: input, shape index: {}]   ;;  %s1874_s2 = inlined_call_operand.vmem [shape: f32[2,10], index: 2, kind: input, shape index: {}]   ;;  %s1875_s3 = inlined_call_operand.vmem [shape: bf16[320,50], index: 3, kind: input, shape index: {}]   ;;  %s1876_s4 = inlined_call_operand.vmem [shape: f32[10,50], index: 4, kind: input, shape index: {}]   ;;  %s1877_s5 = inlined_call_operand.vmem [shape: f32[1,50], index: 5, kind: input, shape index: {}]   ;;  %s1878_s6 = inlined_call_operand.vmem [shape: f32[2,80], index: 6, kind: input, shape index: {}]   ;;  %s1879_s7 = inlined_call_operand.vmem [shape: f32[2,16], index: 7, kind: input, shape index: {}]   ;;  %s1880_s8 = inlined_call_operand.vmem [shape: f32[80,4], index: 8, kind: input, shape index: {}]   ;;  %s1881_s9 = inlined_call_operand.vmem [shape: f32[16,4], index: 9, kind: input, shape index: {}]   ;;  %s1882_s10 = inlined_call_operand.vmem [shape: f32[1,4], index: 10, kind: input, shape index: {}]   ;;  %s1883_s11 = inlined_call_operand.hbm [shape: f32[2,4], index: 11, kind: output, shape index: {}]  }
   0x1   :  { %v1342_v0 = vld [vmem:[%s1875_s3 + $0x38] sm:$0xff]  ;;  %v1341_v3 = vld [vmem:[%s1875_s3 + $0x30] sm:$0xff]  ;;  %v1340_v6 = vld [vmem:[%s1875_s3 + $0x28] sm:$0xff] }
   0x2   :  { %v1350_v1 = vld [vmem:[%s1875_s3 + $0x78] sm:$0xff]  ;;  %227 = vmatpush.bf16.msra.mxu0 %v1342_v0  ;;  %v1349_v4 = vld [vmem:[%s1875_s3 + $0x70] sm:$0xff]  ;;  %v1348_v7 = vld [vmem:[%s1875_s3 + $0x68] sm:$0xff] }
   0x3   :  { %v1354_v2 = vld [vmem:[%s1875_s3 + $0x98] sm:$0xff]  ;;  %241 = vmatpush.bf16.msra.mxu1 %v1350_v1  ;;  %v1353_v5 = vld [vmem:[%s1875_s3 + $0x90] sm:$0xff]  ;;  %v1352_v8 = vld [vmem:[%s1875_s3 + $0x88] sm:$0xff] }
   0x4   :  { %259 = vmatpush.bf16.msra.mxu2 %v1354_v2  ;;  %v1585_v9 = vld [vmem:[%s1876_s4 + $0x8] sm:$0x3]  ;;  %v1592_v10 = vld [vmem:[%s1876_s4] sm:$0xff] }
   0x5   :  { %1296 = vmatpush.msk.msra.mxu3 %vm277_vm0, %v1585_v9  ;;  %v1339_v11 = vld [vmem:[%s1875_s3 + $0x20] sm:$0xff] }
   0x6   :  { %228 = vmatpush.bf16.msra.mxu0 %v1341_v3  ;;  %v271_v12 = vld [vmem:[%s1873_s1] sm:$0x3] }
   0x7   :  { %242 = vmatpush.bf16.msra.mxu1 %v1349_v4  ;;  %v1347_v13 = vld [vmem:[%s1875_s3 + $0x60] sm:$0xff] }
   0x8   :  { %260 = vmatpush.bf16.msra.mxu2 %v1353_v5 }
   0xa   :  { %229 = vmatpush.bf16.msra.mxu0 %v1340_v6 }
   0xb   :  { %243 = vmatpush.bf16.msra.mxu1 %v1348_v7 }
   0xc   :  { %16 = vsyncpa [#allocation3], 0  ;;  %261 = vmatpush.bf16.msra.mxu2 %v1352_v8  ;;  %v1351_v14 = vld [vmem:[%s1875_s3 + $0x80] sm:$0xff]  ;;  %296 = vmatpush.msra.mxu3 %v1592_v10  ;;  %v1213_v15 = vld [vmem:[%s1872_s0 + $0x8] sm:$0xf]  ;;  %vm223_vm2 = vcmask 523264  }
   0xd   :  { %v1334_v16 = vld [vmem:[%s1872_s0 + $0x10] sm:$0xf0]  ;;  %1297 = vmatmul.msk.f32.vlgmr.msra.gmra.mxu3 %vm273_vm1, %v271_v12  ;;  %v1338_v17 = vld [vmem:[%s1875_s3 + $0x18] sm:$0xff]  ;;  %v1336_v22 = vld [vmem:[%s1875_s3 + $0x8] sm:$0xff]  ;;  %s1490_s17 = smov 98   ;;  %s1491_s18 = smov 118  }
   0xe   :  { %1299 = vmatpush.msk.msrb.mxu3 %vm277_vm0, %v1585_v9  ;;  %230 = vmatpush.bf16.msra.mxu0 %v1339_v11  ;;  %v1346_v18 = vld [vmem:[%s1875_s3 + $0x58] sm:$0xff]  ;;  %v1214_v19 = vor.u32 %v1334_v16, %v1213_v15  ;;  %v1337_v20 = vld [vmem:[%s1875_s3 + $0x10] sm:$0xff]  ;;  %v1344_v23 = vld [vmem:[%s1875_s3 + $0x48] sm:$0xff]  ;;  %s1492_s19 = smov 30   ;;  %s1493_s15 = smov 40  }
   0xf   :  { %244 = vmatpush.bf16.msra.mxu1 %v1347_v13  ;;  %v1345_v21 = vld [vmem:[%s1875_s3 + $0x50] sm:$0xff]  ;;  %v1335_v24 = vld [vmem:[%s1875_s3] sm:$0xff]  ;;  %v1333_v27 = vld [vmem:[%s1872_s0 + $0x8] sm:$0xf0]  ;;  %s1494_s23 = smov [#allocation2]   ;;  %s1194_s4 = sshll.u32 %s1883_s11, 4  ;;  %s1195_s4 = int_to_ptr.hbm [resolvable:$true] %s1194_s4 }
  0x10   :  { %262 = vmatpush.bf16.msra.mxu2 %v1351_v14  ;;  %363 = vmatpush.msrb.mxu3 %v1592_v10  ;;  %v1343_v25 = vld [vmem:[%s1875_s3 + $0x40] sm:$0xff]  ;;  %v1207_v29 = vld [vmem:[%s1872_s0 + $0xc] sm:$0xf0]  ;;  %s1192_s24 = sshll.u32 %s1494_s23, 4  ;;  %s1193_s24 = int_to_ptr.vmem [resolvable:$true] %s1192_s24 }
  0x11   :  { %v1205_v26 = vld [vmem:[%s1872_s0] sm:$0xf]  ;;  %v1332_v28 = vld [vmem:[%s1872_s0 + $0x4] sm:$0xf]  ;;  %s1487_s0 = smov 108  }
  0x12   :  { %1303 = vmatpush.msk.msra.mxu3 %vm277_vm0, %v1585_v9  ;;  %231 = vmatpush.bf16.msra.mxu0 %v1338_v17  ;;  %v1206_v30 = vor.u32 %v1333_v27, %v1205_v26  ;;  %v1210_v31 = vor.u32 %v1332_v28, %v1207_v29  ;;  %v1665_v32 = vld [vmem:[%s1877_s5] ss:$0 sm:$0xff]  ;;  %s1488_s5 = smov 10  }
  0x13   :  { %245 = vmatpush.bf16.msra.mxu1 %v1346_v18  ;;  %1295 = vmatmul.msk.bf16.vlgmr.msra.gmra.mxu2 %vm223_vm2, %v1214_v19  ;;  %v272_v42 = vld [vmem:[%s1874_s2] sm:$0x3]  ;;  %s1489_s2 = smov 20  }
  0x14   :  { %1319 = vmatpush.msk.msrb.mxu2 %vm277_vm0, %v1585_v9  ;;  %458 = vmatpush.msra.mxu3 %v1592_v10 }
  0x16   :  { %841 = vmatpush.msrb.mxu2 %v1592_v10  ;;  %232 = vmatpush.bf16.msra.mxu0 %v1337_v20 }
  0x17   :  { %246 = vmatpush.bf16.msra.mxu1 %v1345_v21 }
  0x1a   :  { %233 = vmatpush.bf16.msra.mxu0 %v1336_v22 }
  0x1b   :  { %247 = vmatpush.bf16.msra.mxu1 %v1344_v23 }
  0x1e   :  { %234 = vmatpush.bf16.msra.mxu0 %v1335_v24 }
  0x1f   :  { %248 = vmatpush.bf16.msra.mxu1 %v1343_v25 }
  0x21   :  { %235 = vmatmul.bf16.vlgmr.msra.gmra.mxu0 %v1206_v30 }
  0x22   :  { %1327 = vmatpush.msk.msrb.mxu0 %vm277_vm0, %v1585_v9  ;;  %249 = vmatmul.bf16.vlgmr.msra.gmra.mxu1 %v1210_v31 }
  0x24   :  { %1035 = vmatpush.msrb.mxu0 %v1592_v10 }
  0x90   :  { %v298_v38 = vpop.f32.mrf.mxu3 }
  0x96   :  { %v264_v37 = vpop.f32.mrf.mxu2 }
  0x9e   :  { %v236_v33 = vpop.f32.mrf.mxu0 }
  0x9f   :  { %v237_v34 = vadd.f32 %v1665_v32, %v236_v33  ;;  %v250_v35 = vpop.f32.mrf.mxu1 }
  0xa1   :  { %v251_v36 = vadd.f32 %v250_v35, %v237_v34 }
  0xa3   :  { %v1668_v39 = vadd.f32 %v264_v37, %v251_v36 }
  0xa5   :  { %v301_v40 = vadd.f32 %v298_v38, %v1668_v39 }
  0xa7   :  { %1365 = vtanh.f32 %v301_v40  ;;  %v1298_v43 = vmul.f32 -1.442695, %v301_v40 }
  0xa9   :  { %1367 = vpow2.f32 %v1298_v43 }
  0xad   :  { %v1366_v41 = vpop.eup %1365 }
  0xae   :  { %328 = vrot.lane.b32.xlu0 %v1366_v41, %s1487_s0 }
  0xaf   :  { %v1368_v44 = vpop.eup %1367 }
  0xb0   :  { %v305_v45 = vadd.f32 1.0, %v1368_v44 }
  0xb2   :  { %1369 = vrcp.f32 %v305_v45  ;;  %v317_v51 = vand.u32 2147483648, %v305_v45  ;;  %vm311_vm4 = vweird.f32 %v305_v45  ;;  %v315_v52 = vand.u32 2147483647, %v305_v45 }
  0xb4   :  { %v318_v54 = vor.u32 1.1754944e-38, %v317_v51  ;;  %vm316_vm6 = vcmp.eq.f32.partialorder %v315_v52, 8.507059e+37 }
  0xb6   :  { %323 = vrot.lane.b32.xlu0 %v272_v42, %s1488_s5 }
  0xb8   :  { %v1370_v46 = vpop.eup %1369 }
  0xb9   :  { %v307_v47 = vmul.f32 %v1370_v46, %v305_v45  ;;  %vm312_vm3 = vweird.f32 %v1370_v46 }
  0xba   :  { %vm313_vm5 = vmor %vm311_vm4, %vm312_vm3 }
  0xbb   :  { %v308_v48 = vsub.f32 1.0, %v307_v47 }
  0xbd   :  { %v309_v49 = vmul.f32 %v1370_v46, %v308_v48 }
  0xbf   :  { %v310_v50 = vadd.f32 %v1370_v46, %v309_v49 }
  0xc1   :  { %v314_v53 = vsel %vm313_vm5, %v1370_v46, %v310_v50 }
  0xc2   :  { %v319_v56 = vsel %vm316_vm6, %v318_v54, %v314_v53 }
 0x120   :  { %v329_v55 = vpop.permute.xlu0 %328 }
 0x121   :  { %v331_v57 = vmul.f32 %v329_v55, %v319_v56 }
 0x123   :  { %333 = vrot.lane.b32.xlu1 %v331_v57, %s1488_s5 }
 0x128   :  { %v324_v58 = vpop.permute.xlu0 %323 }
 0x129   :  { %v326_v59 = vmul.f32 %v324_v58, %v319_v56 }
 0x195   :  { %v334_v60 = vpop.permute.xlu1 %333 }
 0x196   :  { %v336_v61 = vadd.f32 %v334_v60, %v326_v59 }
 0x198   :  { %1371 = vtanh.f32 %v336_v61  ;;  %v418_v23 = vrot.slane %v336_v61, 6 }
 0x19e   :  { %v1372_v62 = vpop.eup %1371 }
 0x19f   :  { %339 = vrot.lane.b32.xlu1 %v1372_v62, %s1489_s2 }
 0x211   :  { %v340_v63 = vpop.permute.xlu1 %339 }
 0x212   :  { %v1678_v0 = vmul.f32 %v340_v63, %v319_v56 }
 0x214   :  { %344 = vrot.lane.b32.xlu2 %v1678_v0, %s1490_s17 }
 0x26e   :  { %v345_v1 = vpop.permute.xlu2 %344 }
 0x26f   :  { %1300 = vmatmul.msk.f32.vlgmr.msrb.gmra.mxu3 %vm273_vm1, %v345_v1 }
 0x270   :  { %1307 = vmatpush.msk.msrb.mxu3 %vm277_vm0, %v1585_v9 }
 0x272   :  { %555 = vmatpush.msrb.mxu3 %v1592_v10 }
 0x2f2   :  { %v1686_v2 = vpop.f32.mrf.mxu3 }
 0x2f3   :  { %v394_v3 = vrot.slane %v1686_v2, 6 }
 0x2f5   :  { %v396_v4 = vadd.f32 %v394_v3, %v1668_v39 }
 0x2f7   :  { %1373 = vtanh.f32 %v396_v4  ;;  %v1302_v6 = vmul.f32 -1.442695, %v396_v4 }
 0x2f9   :  { %1375 = vpow2.f32 %v1302_v6 }
 0x2fd   :  { %v1374_v5 = vpop.eup %1373 }
 0x2fe   :  { %422 = vrot.lane.b32.xlu2 %v1374_v5, %s1487_s0 }
 0x2ff   :  { %v1376_v7 = vpop.eup %1375 }
 0x300   :  { %v400_v8 = vadd.f32 1.0, %v1376_v7 }
 0x302   :  { %1377 = vrcp.f32 %v400_v8  ;;  %v412_v16 = vand.u32 2147483648, %v400_v8  ;;  %vm406_vm8 = vweird.f32 %v400_v8  ;;  %v410_v17 = vand.u32 2147483647, %v400_v8 }
 0x304   :  { %v413_v19 = vor.u32 1.1754944e-38, %v412_v16  ;;  %vm411_vm10 = vcmp.eq.f32.partialorder %v410_v17, 8.507059e+37 }
 0x308   :  { %v1378_v11 = vpop.eup %1377 }
 0x309   :  { %v402_v12 = vmul.f32 %v1378_v11, %v400_v8  ;;  %vm407_vm7 = vweird.f32 %v1378_v11 }
 0x30a   :  { %vm408_vm9 = vmor %vm406_vm8, %vm407_vm7 }
 0x30b   :  { %v403_v13 = vsub.f32 1.0, %v402_v12 }
 0x30d   :  { %v404_v14 = vmul.f32 %v1378_v11, %v403_v13 }
 0x30f   :  { %v405_v15 = vadd.f32 %v1378_v11, %v404_v14 }
 0x311   :  { %v409_v18 = vsel %vm408_vm9, %v1378_v11, %v405_v15 }
 0x312   :  { %v414_v21 = vsel %vm411_vm10, %v413_v19, %v409_v18 }
 0x313   :  { %v420_v24 = vmul.f32 %v418_v23, %v414_v21 }
 0x358   :  { %v423_v20 = vpop.permute.xlu2 %422 }
 0x359   :  { %v425_v22 = vmul.f32 %v423_v20, %v414_v21 }
 0x35b   :  { %427 = vrot.lane.b32.xlu0 %v425_v22, %s1488_s5 }
 0x3cd   :  { %v428_v25 = vpop.permute.xlu0 %427 }
 0x3ce   :  { %v430_v26 = vadd.f32 %v428_v25, %v420_v24 }
 0x3d0   :  { %1379 = vtanh.f32 %v430_v26  ;;  %v515_v53 = vrot.slane %v430_v26, 6 }
 0x3d6   :  { %v1380_v27 = vpop.eup %1379 }
 0x3d7   :  { %433 = vrot.lane.b32.xlu1 %v1380_v27, %s1489_s2 }
 0x449   :  { %v434_v28 = vpop.permute.xlu1 %433 }
 0x44a   :  { %v1693_v29 = vmul.f32 %v434_v28, %v414_v21 }
 0x44c   :  { %v438_v30 = vrot.slane %v1693_v29, 2 }
 0x44e   :  { %439 = vrot.lane.b32.xlu2 %v438_v30, %s1490_s17 }
 0x4a8   :  { %v440_v31 = vpop.permute.xlu2 %439 }
 0x4a9   :  { %1304 = vmatmul.msk.f32.vlgmr.msra.gmra.mxu3 %vm273_vm1, %v440_v31  ;;  %v238_v31 = vpop.f32.mrf.mxu0 }
 0x4aa   :  { %1311 = vmatpush.msk.msra.mxu3 %vm277_vm0, %v1585_v9 }
 0x4ac   :  { %652 = vmatpush.msra.mxu3 %v1592_v10 }
 0x52c   :  { %v1701_v33 = vpop.f32.mrf.mxu3 }
 0x52d   :  { %v491_v34 = vrot.slane %v1701_v33, 4 }
 0x52f   :  { %v493_v35 = vadd.f32 %v491_v34, %v1668_v39  ;;  %v239_v34 = vadd.f32 %v1665_v32, %v238_v31 }
 0x531   :  { %1381 = vtanh.f32 %v493_v35  ;;  %v1306_v37 = vmul.f32 -1.442695, %v493_v35  ;;  %v252_v35 = vpop.f32.mrf.mxu1 }
 0x533   :  { %1383 = vpow2.f32 %v1306_v37  ;;  %v266_v37 = vpop.f32.mrf.mxu2 }
 0x537   :  { %v1382_v36 = vpop.eup %1381 }
 0x538   :  { %519 = vrot.lane.b32.xlu0 %v1382_v36, %s1487_s0  ;;  %v253_v36 = vadd.f32 %v252_v35, %v239_v34 }
 0x539   :  { %v1384_v38 = vpop.eup %1383 }
 0x53a   :  { %v497_v40 = vadd.f32 1.0, %v1384_v38  ;;  %v1732_v38 = vadd.f32 %v266_v37, %v253_v36 }
 0x53c   :  { %1385 = vrcp.f32 %v497_v40  ;;  %v509_v46 = vand.u32 2147483648, %v497_v40  ;;  %vm503_vm12 = vweird.f32 %v497_v40  ;;  %v507_v47 = vand.u32 2147483647, %v497_v40 }
 0x53e   :  { %v510_v49 = vor.u32 1.1754944e-38, %v509_v46  ;;  %vm508_vm14 = vcmp.eq.f32.partialorder %v507_v47, 8.507059e+37 }
 0x542   :  { %v1386_v41 = vpop.eup %1385 }
 0x543   :  { %v499_v42 = vmul.f32 %v1386_v41, %v497_v40  ;;  %vm504_vm11 = vweird.f32 %v1386_v41 }
 0x544   :  { %vm505_vm13 = vmor %vm503_vm12, %vm504_vm11 }
 0x545   :  { %v500_v43 = vsub.f32 1.0, %v499_v42 }
 0x547   :  { %v501_v44 = vmul.f32 %v1386_v41, %v500_v43 }
 0x549   :  { %v502_v45 = vadd.f32 %v1386_v41, %v501_v44 }
 0x54b   :  { %v506_v48 = vsel %vm505_vm13, %v1386_v41, %v502_v45 }
 0x54c   :  { %v511_v51 = vsel %vm508_vm14, %v510_v49, %v506_v48 }
 0x54d   :  { %v517_v54 = vmul.f32 %v515_v53, %v511_v51 }
 0x5aa   :  { %v520_v50 = vpop.permute.xlu0 %519 }
 0x5ab   :  { %v522_v52 = vmul.f32 %v520_v50, %v511_v51 }
 0x5ad   :  { %524 = vrot.lane.b32.xlu1 %v522_v52, %s1488_s5 }
 0x61f   :  { %v525_v55 = vpop.permute.xlu1 %524 }
 0x620   :  { %v527_v56 = vadd.f32 %v525_v55, %v517_v54 }
 0x622   :  { %1387 = vtanh.f32 %v527_v56  ;;  %v612_v21 = vrot.slane %v527_v56, 6 }
 0x628   :  { %v1388_v57 = vpop.eup %1387 }
 0x629   :  { %530 = vrot.lane.b32.xlu2 %v1388_v57, %s1489_s2 }
 0x683   :  { %v531_v58 = vpop.permute.xlu2 %530 }
 0x684   :  { %v1708_v59 = vmul.f32 %v531_v58, %v511_v51 }
 0x686   :  { %v535_v60 = vrot.slane %v1708_v59, 4 }
 0x688   :  { %536 = vrot.lane.b32.xlu0 %v535_v60, %s1490_s17 }
 0x6fa   :  { %v537_v61 = vpop.permute.xlu0 %536 }
 0x6fb   :  { %1308 = vmatmul.msk.f32.vlgmr.msrb.gmra.mxu3 %vm273_vm1, %v537_v61 }
 0x6fc   :  { %1315 = vmatpush.msk.msrb.mxu3 %vm277_vm0, %v1585_v9 }
 0x6fe   :  { %746 = vmatpush.msrb.mxu3 %v1592_v10 }
 0x77e   :  { %v1716_v62 = vpop.f32.mrf.mxu3 }
 0x77f   :  { %v588_v63 = vrot.slane %v1716_v62, 2 }
 0x781   :  { %v590_v1 = vadd.f32 %v588_v63, %v1668_v39 }
 0x783   :  { %1389 = vtanh.f32 %v590_v1  ;;  %v1310_v4 = vmul.f32 -1.442695, %v590_v1 }
 0x785   :  { %1391 = vpow2.f32 %v1310_v4 }
 0x789   :  { %v1390_v3 = vpop.eup %1389 }
 0x78a   :  { %616 = vrot.lane.b32.xlu1 %v1390_v3, %s1487_s0 }
 0x78b   :  { %v1392_v5 = vpop.eup %1391 }
 0x78c   :  { %v594_v6 = vadd.f32 1.0, %v1392_v5 }
 0x78e   :  { %1393 = vrcp.f32 %v594_v6  ;;  %v606_v14 = vand.u32 2147483648, %v594_v6  ;;  %vm600_vm2 = vweird.f32 %v594_v6  ;;  %v604_v15 = vand.u32 2147483647, %v594_v6 }
 0x790   :  { %v607_v17 = vor.u32 1.1754944e-38, %v606_v14  ;;  %vm605_vm4 = vcmp.eq.f32.partialorder %v604_v15, 8.507059e+37 }
 0x794   :  { %v1394_v7 = vpop.eup %1393 }
 0x795   :  { %v596_v8 = vmul.f32 %v1394_v7, %v594_v6  ;;  %vm601_vm15 = vweird.f32 %v1394_v7 }
 0x796   :  { %vm602_vm3 = vmor %vm600_vm2, %vm601_vm15 }
 0x797   :  { %v597_v11 = vsub.f32 1.0, %v596_v8 }
 0x799   :  { %v598_v12 = vmul.f32 %v1394_v7, %v597_v11 }
 0x79b   :  { %v599_v13 = vadd.f32 %v1394_v7, %v598_v12 }
 0x79d   :  { %v603_v16 = vsel %vm602_vm3, %v1394_v7, %v599_v13 }
 0x79e   :  { %v608_v19 = vsel %vm605_vm4, %v607_v17, %v603_v16 }
 0x79f   :  { %v614_v22 = vmul.f32 %v612_v21, %v608_v19 }
 0x7fc   :  { %v617_v18 = vpop.permute.xlu1 %616 }
 0x7fd   :  { %v619_v20 = vmul.f32 %v617_v18, %v608_v19 }
 0x7ff   :  { %621 = vrot.lane.b32.xlu2 %v619_v20, %s1488_s5 }
 0x859   :  { %v622_v23 = vpop.permute.xlu2 %621 }
 0x85a   :  { %v624_v24 = vadd.f32 %v622_v23, %v614_v22 }
 0x85c   :  { %1395 = vtanh.f32 %v624_v24  ;;  %v707_v55 = vrot.slane %v624_v24, 6 }
 0x862   :  { %v1396_v25 = vpop.eup %1395 }
 0x863   :  { %627 = vrot.lane.b32.xlu0 %v1396_v25, %s1489_s2 }
 0x8d5   :  { %v628_v26 = vpop.permute.xlu0 %627 }
 0x8d6   :  { %v1723_v27 = vmul.f32 %v628_v26, %v608_v19 }
 0x8d8   :  { %v632_v28 = vrot.slane %v1723_v27, 6 }
 0x8da   :  { %633 = vrot.lane.b32.xlu1 %v632_v28, %s1490_s17 }
 0x94c   :  { %v634_v30 = vpop.permute.xlu1 %633 }
 0x94d   :  { %1312 = vmatmul.msk.f32.vlgmr.msra.gmra.mxu3 %vm273_vm1, %v634_v30 }
 0x94e   :  { %1323 = vmatpush.msk.msra.mxu3 %vm277_vm0, %v1585_v9 }
 0x950   :  { %938 = vmatpush.msra.mxu3 %v1592_v10 }
 0x9d0   :  { %v1734_v40 = vpop.f32.mrf.mxu3 }
 0x9d1   :  { %v685_v41 = vadd.f32 %v1734_v40, %v1732_v38 }
 0x9d3   :  { %1397 = vtanh.f32 %v685_v41  ;;  %v1314_v9 = vmul.f32 -1.442695, %v685_v41 }
 0x9d5   :  { %1399 = vpow2.f32 %v1314_v9 }
 0x9d9   :  { %v1398_v42 = vpop.eup %1397 }
 0x9da   :  { %711 = vrot.lane.b32.xlu2 %v1398_v42, %s1487_s0 }
 0x9db   :  { %v1400_v10 = vpop.eup %1399 }
 0x9dc   :  { %v689_v43 = vadd.f32 1.0, %v1400_v10 }
 0x9de   :  { %1401 = vrcp.f32 %v689_v43  ;;  %v701_v48 = vand.u32 2147483648, %v689_v43  ;;  %vm695_vm5 = vweird.f32 %v689_v43  ;;  %v699_v49 = vand.u32 2147483647, %v689_v43 }
 0x9e0   :  { %v702_v51 = vor.u32 1.1754944e-38, %v701_v48  ;;  %vm700_vm7 = vcmp.eq.f32.partialorder %v699_v49, 8.507059e+37 }
 0x9e4   :  { %v1402_v32 = vpop.eup %1401 }
 0x9e5   :  { %v691_v44 = vmul.f32 %v1402_v32, %v689_v43  ;;  %vm696_vm0 = vweird.f32 %v1402_v32 }
 0x9e6   :  { %vm697_vm6 = vmor %vm695_vm5, %vm696_vm0 }
 0x9e7   :  { %v692_v45 = vsub.f32 1.0, %v691_v44 }
 0x9e9   :  { %v693_v46 = vmul.f32 %v1402_v32, %v692_v45 }
 0x9eb   :  { %v694_v47 = vadd.f32 %v1402_v32, %v693_v46 }
 0x9ed   :  { %v698_v50 = vsel %vm697_vm6, %v1402_v32, %v694_v47 }
 0x9ee   :  { %v703_v53 = vsel %vm700_vm7, %v702_v51, %v698_v50 }
 0x9ef   :  { %v709_v56 = vmul.f32 %v707_v55, %v703_v53 }
 0xa34   :  { %v712_v52 = vpop.permute.xlu2 %711 }
 0xa35   :  { %v714_v54 = vmul.f32 %v712_v52, %v703_v53 }
 0xa37   :  { %716 = vrot.lane.b32.xlu0 %v714_v54, %s1488_s5 }
 0xaa9   :  { %v717_v57 = vpop.permute.xlu0 %716 }
 0xaaa   :  { %v719_v58 = vadd.f32 %v717_v57, %v709_v56 }
 0xaac   :  { %1403 = vtanh.f32 %v719_v58  ;;  %v801_v24 = vrot.slane %v719_v58, 6 }
 0xab2   :  { %v1404_v60 = vpop.eup %1403 }
 0xab3   :  { %722 = vrot.lane.b32.xlu1 %v1404_v60, %s1489_s2 }
 0xb25   :  { %v723_v61 = vpop.permute.xlu1 %722 }
 0xb26   :  { %v1741_v63 = vmul.f32 %v723_v61, %v703_v53 }
 0xb28   :  { %727 = vrot.lane.b32.xlu2 %v1741_v63, %s1490_s17 }
 0xb82   :  { %v728_v1 = vpop.permute.xlu2 %727 }
 0xb83   :  { %1316 = vmatmul.msk.f32.vlgmr.msrb.gmra.mxu3 %vm273_vm1, %v728_v1 }
 0xc06   :  { %v1746_v3 = vpop.f32.mrf.mxu3 }
 0xc07   :  { %v777_v4 = vrot.slane %v1746_v3, 6 }
 0xc09   :  { %v779_v5 = vadd.f32 %v777_v4, %v1732_v38 }
 0xc0b   :  { %1405 = vtanh.f32 %v779_v5  ;;  %v1318_v7 = vmul.f32 -1.442695, %v779_v5 }
 0xc0d   :  { %1407 = vpow2.f32 %v1318_v7 }
 0xc11   :  { %v1406_v6 = vpop.eup %1405 }
 0xc12   :  { %805 = vrot.lane.b32.xlu0 %v1406_v6, %s1487_s0 }
 0xc13   :  { %v1408_v8 = vpop.eup %1407 }
 0xc14   :  { %v783_v11 = vadd.f32 1.0, %v1408_v8 }
 0xc16   :  { %1409 = vrcp.f32 %v783_v11  ;;  %v795_v17 = vand.u32 2147483648, %v783_v11  ;;  %vm789_vm9 = vweird.f32 %v783_v11  ;;  %v793_v18 = vand.u32 2147483647, %v783_v11 }
 0xc18   :  { %v796_v20 = vor.u32 1.1754944e-38, %v795_v17  ;;  %vm794_vm11 = vcmp.eq.f32.partialorder %v793_v18, 8.507059e+37 }
 0xc1c   :  { %v1410_v12 = vpop.eup %1409 }
 0xc1d   :  { %v785_v13 = vmul.f32 %v1410_v12, %v783_v11  ;;  %vm790_vm8 = vweird.f32 %v1410_v12 }
 0xc1e   :  { %vm791_vm10 = vmor %vm789_vm9, %vm790_vm8 }
 0xc1f   :  { %v786_v14 = vsub.f32 1.0, %v785_v13 }
 0xc21   :  { %v787_v15 = vmul.f32 %v1410_v12, %v786_v14  ;;  %v464_v14 = vrot.slane %v1701_v33, 6 }
 0xc23   :  { %v788_v16 = vadd.f32 %v1410_v12, %v787_v15  ;;  %v466_v15 = vadd.f32 %v464_v14, %v1668_v39 }
 0xc25   :  { %v792_v19 = vsel %vm791_vm10, %v1410_v12, %v788_v16  ;;  %v1305_v17 = vmul.f32 -1.442695, %v466_v15 }
 0xc26   :  { %v797_v22 = vsel %vm794_vm11, %v796_v20, %v792_v19 }
 0xc27   :  { %v803_v25 = vmul.f32 %v801_v24, %v797_v22 }
 0xc84   :  { %v806_v21 = vpop.permute.xlu0 %805 }
 0xc85   :  { %v808_v23 = vmul.f32 %v806_v21, %v797_v22 }
 0xc87   :  { %810 = vrot.lane.b32.xlu1 %v808_v23, %s1488_s5 }
 0xcf9   :  { %v811_v26 = vpop.permute.xlu1 %810 }
 0xcfa   :  { %v813_v28 = vadd.f32 %v811_v26, %v803_v25 }
 0xcfc   :  { %1411 = vtanh.f32 %v813_v28  ;;  %v898_v56 = vrot.slane %v813_v28, 6 }
 0xd02   :  { %v1412_v30 = vpop.eup %1411 }
 0xd03   :  { %816 = vrot.lane.b32.xlu2 %v1412_v30, %s1489_s2 }
 0xd5d   :  { %v817_v31 = vpop.permute.xlu2 %816 }
 0xd5e   :  { %v1753_v34 = vmul.f32 %v817_v31, %v797_v22 }
 0xd60   :  { %v821_v35 = vrot.slane %v1753_v34, 2 }
 0xd62   :  { %822 = vrot.lane.b32.xlu0 %v821_v35, %s1490_s17 }
 0xdd4   :  { %v823_v36 = vpop.permute.xlu0 %822 }
 0xdd5   :  { %1320 = vmatmul.msk.f32.vlgmr.msrb.gmra.mxu2 %vm273_vm1, %v823_v36 }
 0xe58   :  { %v843_v37 = vpop.f32.mrf.mxu2 }
 0xe59   :  { %v874_v41 = vrot.slane %v843_v37, 4  ;;  %v847_v18 = vrot.slane %v843_v37, 6 }
 0xe5b   :  { %v876_v42 = vadd.f32 %v874_v41, %v1732_v38  ;;  %v849_v20 = vadd.f32 %v847_v18, %v1732_v38 }
 0xe5d   :  { %1413 = vtanh.f32 %v876_v42  ;;  %v1322_v10 = vmul.f32 -1.442695, %v876_v42  ;;  %v1321_v21 = vmul.f32 -1.442695, %v849_v20 }
 0xe5f   :  { %1415 = vpow2.f32 %v1322_v10 }
 0xe63   :  { %v1414_v9 = vpop.eup %1413 }
 0xe64   :  { %902 = vrot.lane.b32.xlu1 %v1414_v9, %s1487_s0 }
 0xe65   :  { %v1416_v43 = vpop.eup %1415 }
 0xe66   :  { %v880_v32 = vadd.f32 1.0, %v1416_v43 }
 0xe68   :  { %1417 = vrcp.f32 %v880_v32  ;;  %v892_v49 = vand.u32 2147483648, %v880_v32  ;;  %vm886_vm13 = vweird.f32 %v880_v32  ;;  %v890_v50 = vand.u32 2147483647, %v880_v32 }
 0xe6a   :  { %v893_v52 = vor.u32 1.1754944e-38, %v892_v49  ;;  %vm891_vm15 = vcmp.eq.f32.partialorder %v890_v50, 8.507059e+37 }
 0xe6e   :  { %v1418_v44 = vpop.eup %1417 }
 0xe6f   :  { %v882_v45 = vmul.f32 %v1418_v44, %v880_v32  ;;  %vm887_vm12 = vweird.f32 %v1418_v44 }
 0xe70   :  { %vm888_vm14 = vmor %vm886_vm13, %vm887_vm12 }
 0xe71   :  { %v883_v46 = vsub.f32 1.0, %v882_v45 }
 0xe73   :  { %v884_v47 = vmul.f32 %v1418_v44, %v883_v46 }
 0xe75   :  { %v885_v48 = vadd.f32 %v1418_v44, %v884_v47 }
 0xe77   :  { %v889_v51 = vsel %vm888_vm14, %v1418_v44, %v885_v48 }
 0xe78   :  { %v894_v54 = vsel %vm891_vm15, %v893_v52, %v889_v51 }
 0xe79   :  { %v900_v57 = vmul.f32 %v898_v56, %v894_v54 }
 0xed6   :  { %v903_v53 = vpop.permute.xlu1 %902 }
 0xed7   :  { %v905_v55 = vmul.f32 %v903_v53, %v894_v54 }
 0xed9   :  { %907 = vrot.lane.b32.xlu2 %v905_v55, %s1488_s5 }
 0xf33   :  { %v908_v58 = vpop.permute.xlu2 %907 }
 0xf34   :  { %v1761_v60 = vadd.f32 %v908_v58, %v900_v57 }
 0xf36   :  { %1419 = vtanh.f32 %v1761_v60 }
 0xf3c   :  { %v1420_v61 = vpop.eup %1419 }
 0xf3d   :  { %913 = vrot.lane.b32.xlu0 %v1420_v61, %s1489_s2 }
 0xfaf   :  { %v914_v1 = vpop.permute.xlu0 %913 }
 0xfb0   :  { %v1765_v4 = vmul.f32 %v914_v1, %v894_v54 }
 0xfb2   :  { %v918_v5 = vrot.slane %v1765_v4, 4 }
 0xfb4   :  { %919 = vrot.lane.b32.xlu1 %v918_v5, %s1490_s17 }
0x1026   :  { %v920_v6 = vpop.permute.xlu1 %919 }
0x1027   :  { %1324 = vmatmul.msk.f32.vlgmr.msra.gmra.mxu3 %vm273_vm1, %v920_v6  ;;  %v561_v6 = vrot.slane %v1716_v62, 4 }
0x10aa   :  { %v1770_v7 = vpop.f32.mrf.mxu3 }
0x10ab   :  { %v971_v8 = vrot.slane %v1770_v7, 2 }
0x10ad   :  { %v973_v11 = vadd.f32 %v971_v8, %v1732_v38  ;;  %v563_v8 = vadd.f32 %v561_v6, %v1668_v39 }
0x10af   :  { %1421 = vtanh.f32 %v973_v11  ;;  %v1326_v13 = vmul.f32 -1.442695, %v973_v11  ;;  %v1309_v11 = vmul.f32 -1.442695, %v563_v8 }
0x10b1   :  { %1423 = vpow2.f32 %v1326_v13  ;;  %v658_v13 = vrot.slane %v1734_v40, 2 }
0x10b2   :  { %1425 = vpow2.f32 %v1305_v17 }
0x10b5   :  { %v1422_v12 = vpop.eup %1421 }
0x10b6   :  { %999 = vrot.lane.b32.xlu2 %v1422_v12, %s1487_s0  ;;  %v751_v12 = vadd.f32 %v1746_v3, %v1732_v38 }
0x10b7   :  { %v1424_v16 = vpop.eup %1423 }
0x10b8   :  { %v977_v19 = vadd.f32 1.0, %v1424_v16  ;;  %v1426_v22 = vpop.eup %1425  ;;  %v1317_v14 = vmul.f32 -1.442695, %v751_v12  ;;  %v660_v16 = vadd.f32 %v658_v13, %v1668_v39 }
0x10b9   :  { %v470_v24 = vadd.f32 1.0, %v1426_v22 }
0x10ba   :  { %1427 = vrcp.f32 %v977_v19  ;;  %v989_v37 = vand.u32 2147483648, %v977_v19  ;;  %vm983_vm3 = vweird.f32 %v977_v19  ;;  %v987_v41 = vand.u32 2147483647, %v977_v19 }
0x10bb   :  { %1429 = vpow2.f32 %v1321_v21  ;;  %v482_v50 = vand.u32 2147483648, %v470_v24  ;;  %vm476_vm6 = vweird.f32 %v470_v24  ;;  %v480_v51 = vand.u32 2147483647, %v470_v24 }
0x10bc   :  { %1431 = vrcp.f32 %v470_v24  ;;  %v990_v43 = vor.u32 1.1754944e-38, %v989_v37  ;;  %vm988_vm0 = vcmp.eq.f32.partialorder %v987_v41, 8.507059e+37  ;;  %v1313_v18 = vmul.f32 -1.442695, %v660_v16 }
0x10bd   :  { %v483_v54 = vor.u32 1.1754944e-38, %v482_v50  ;;  %vm481_vm8 = vcmp.eq.f32.partialorder %v480_v51, 8.507059e+37  ;;  %v995_v21 = vrot.slane %v1761_v60, 6 }
0x10c0   :  { %v1428_v23 = vpop.eup %1427 }
0x10c1   :  { %v979_v25 = vmul.f32 %v1428_v23, %v977_v19  ;;  %v1430_v26 = vpop.eup %1429  ;;  %vm984_vm2 = vweird.f32 %v1428_v23 }
0x10c2   :  { %v853_v28 = vadd.f32 1.0, %v1430_v26  ;;  %v1432_v30 = vpop.eup %1431  ;;  %vm985_vm4 = vmor %vm983_vm3, %vm984_vm2 }
0x10c3   :  { %v980_v33 = vsub.f32 1.0, %v979_v25  ;;  %v472_v35 = vmul.f32 %v1432_v30, %v470_v24  ;;  %vm477_vm5 = vweird.f32 %v1432_v30 }
0x10c4   :  { %1433 = vrcp.f32 %v853_v28  ;;  %vm478_vm7 = vmor %vm476_vm6, %vm477_vm5  ;;  %v865_v57 = vand.u32 2147483648, %v853_v28  ;;  %vm859_vm10 = vweird.f32 %v853_v28  ;;  %v863_v58 = vand.u32 2147483647, %v853_v28 }
0x10c5   :  { %v981_v31 = vmul.f32 %v1428_v23, %v980_v33  ;;  %v473_v42 = vsub.f32 1.0, %v472_v35  ;;  %1435 = vpow2.f32 %v1309_v11 }
0x10c6   :  { %v866_v1 = vor.u32 1.1754944e-38, %v865_v57  ;;  %vm864_vm12 = vcmp.eq.f32.partialorder %v863_v58, 8.507059e+37  ;;  %1437 = vpow2.f32 %v1317_v14 }
0x10c7   :  { %v982_v36 = vadd.f32 %v1428_v23, %v981_v31  ;;  %v474_v32 = vmul.f32 %v1432_v30, %v473_v42 }
0x10c9   :  { %v986_v10 = vsel %vm985_vm4, %v1428_v23, %v982_v36  ;;  %v475_v48 = vadd.f32 %v1432_v30, %v474_v32 }
0x10ca   :  { %v1434_v9 = vpop.eup %1433  ;;  %v1778_v46 = vsel %vm988_vm0, %v990_v43, %v986_v10 }
0x10cb   :  { %v855_v44 = vmul.f32 %v1434_v9, %v853_v28  ;;  %v479_v52 = vsel %vm478_vm7, %v1432_v30, %v475_v48  ;;  %vm860_vm9 = vweird.f32 %v1434_v9  ;;  %v1436_v15 = vpop.eup %1435  ;;  %v997_v3 = vmul.f32 %v995_v21, %v1778_v46 }
0x10cc   :  { %v484_v55 = vsel %vm481_vm8, %v483_v54, %v479_v52  ;;  %vm861_vm11 = vmor %vm859_vm10, %vm860_vm9  ;;  %v567_v17 = vadd.f32 1.0, %v1436_v15  ;;  %v1438_v19 = vpop.eup %1437 }
0x10cd   :  { %v856_v49 = vsub.f32 1.0, %v855_v44  ;;  %v755_v62 = vadd.f32 1.0, %v1438_v19 }
0x10ce   :  { %1439 = vrcp.f32 %v567_v17  ;;  %v579_v37 = vand.u32 2147483648, %v567_v17  ;;  %vm573_vm14 = vweird.f32 %v567_v17  ;;  %v577_v41 = vand.u32 2147483647, %v567_v17 }
0x10cf   :  { %v857_v53 = vmul.f32 %v1434_v9, %v856_v49  ;;  %1441 = vpow2.f32 %v1313_v18  ;;  %vm761_vm4 = vweird.f32 %v755_v62  ;;  %v765_v48 = vand.u32 2147483647, %v755_v62 }
0x10d0   :  { %1443 = vrcp.f32 %v755_v62  ;;  %v580_v43 = vor.u32 1.1754944e-38, %v579_v37  ;;  %vm578_vm2 = vcmp.eq.f32.partialorder %v577_v41, 8.507059e+37 }
0x10d1   :  { %v858_v56 = vadd.f32 %v1434_v9, %v857_v53  ;;  %vm766_vm5 = vcmp.eq.f32.partialorder %v765_v48, 8.507059e+37 }
0x10d3   :  { %v862_v61 = vsel %vm861_vm11, %v1434_v9, %v858_v56 }
0x10d4   :  { %v867_v5 = vsel %vm864_vm12, %v866_v1, %v862_v61  ;;  %v1440_v20 = vpop.eup %1439  ;;  %v368_v61 = vadd.f32 %v1686_v2, %v1668_v39 }
0x10d5   :  { %v1442_v22 = vpop.eup %1441  ;;  %v569_v23 = vmul.f32 %v1440_v20, %v567_v17  ;;  %vm574_vm13 = vweird.f32 %v1440_v20 }
0x10d6   :  { %v664_v24 = vadd.f32 1.0, %v1442_v22  ;;  %v1444_v33 = vpop.eup %1443  ;;  %vm575_vm15 = vmor %vm573_vm14, %vm574_vm13  ;;  %v1301_v1 = vmul.f32 -1.442695, %v368_v61 }
0x10d7   :  { %v570_v26 = vsub.f32 1.0, %v569_v23  ;;  %v757_v30 = vmul.f32 %v1444_v33, %v755_v62  ;;  %vm762_vm3 = vweird.f32 %v1444_v33 }
0x10d8   :  { %vm763_vm0 = vmor %vm761_vm4, %vm762_vm3  ;;  %v676_v54 = vand.u32 2147483648, %v664_v24  ;;  %vm670_vm7 = vweird.f32 %v664_v24 }
0x10d9   :  { %v571_v28 = vmul.f32 %v1440_v20, %v570_v26  ;;  %v758_v36 = vsub.f32 1.0, %v757_v30 }
0x10da   :  { %v677_v57 = vor.u32 1.1754944e-38, %v676_v54 }
0x10db   :  { %v572_v35 = vadd.f32 %v1440_v20, %v571_v28  ;;  %v759_v9 = vmul.f32 %v1444_v33, %v758_v36 }
0x10dd   :  { %v576_v42 = vsel %vm575_vm15, %v1440_v20, %v572_v35  ;;  %v760_v44 = vadd.f32 %v1444_v33, %v759_v9 }
0x10de   :  { %v581_v32 = vsel %vm578_vm2, %v580_v43, %v576_v42 }
0x10df   :  { %v764_v49 = vsel %vm763_vm0, %v1444_v33, %v760_v44 }
0x1110   :  { %v1000_v45 = vpop.permute.xlu2 %999 }
0x1111   :  { %v1002_v47 = vmul.f32 %v1000_v45, %v1778_v46 }
0x1113   :  { %1004 = vrot.lane.b32.xlu0 %v1002_v47, %s1488_s5  ;;  %v767_v47 = vand.u32 2147483648, %v755_v62 }
0x1115   :  { %v768_v51 = vor.u32 1.1754944e-38, %v767_v47 }
0x1117   :  { %v769_v52 = vsel %vm766_vm5, %v768_v51, %v764_v49 }
0x111b   :  { %487 = vrot.lane.b32.xlu0 %v484_v55, %s1491_s18  ;;  %v674_v55 = vand.u32 2147483647, %v664_v24 }
0x111d   :  { %vm675_vm9 = vcmp.eq.f32.partialorder %v674_v55, 8.507059e+37 }
0x1123   :  { %870 = vrot.lane.b32.xlu0 %v867_v5, %s1491_s18  ;;  %v944_v5 = vrot.slane %v1770_v7, 4 }
0x1125   :  { %v946_v6 = vadd.f32 %v944_v5, %v1732_v38 }
0x1127   :  { %v1325_v8 = vmul.f32 -1.442695, %v946_v6 }
0x1185   :  { %v1005_v40 = vpop.permute.xlu0 %1004 }
0x1186   :  { %v1007_v25 = vadd.f32 %v1005_v40, %v997_v3 }
0x1188   :  { %1445 = vtanh.f32 %v1007_v25 }
0x1189   :  { %1447 = vrcp.f32 %v664_v24 }
0x118a   :  { %1449 = vpow2.f32 %v1301_v1 }
0x118b   :  { %1451 = vpow2.f32 %v1325_v8  ;;  %v1128_v8 = vld [vmem:[%s1880_s8 + $0x48] sm:$0xff] }
0x118c   :  { %1166 = vmatpush.msra.mxu2 %v1128_v8 }
0x118d   :  { %v488_v55 = vpop.permute.xlu0 %487 }
0x118e   :  { %v1446_v31 = vpop.eup %1445 }
0x118f   :  { %1010 = vrot.lane.b32.xlu1 %v1446_v31, %s1489_s2  ;;  %v1448_v60 = vpop.eup %1447 }
0x1190   :  { %v666_v10 = vmul.f32 %v1448_v60, %v664_v24  ;;  %vm671_vm6 = vweird.f32 %v1448_v60  ;;  %v1450_v11 = vpop.eup %1449 }
0x1191   :  { %vm672_vm8 = vmor %vm670_vm7, %vm671_vm6  ;;  %v372_v12 = vadd.f32 1.0, %v1450_v11  ;;  %v1452_v13 = vpop.eup %1451  ;;  %v1127_v11 = vld [vmem:[%s1880_s8 + $0x40] sm:$0xff]  ;;  %vm1132_vm7 = vcmask 130048  }
0x1192   :  { %v667_v45 = vsub.f32 1.0, %v666_v10  ;;  %v950_v14 = vadd.f32 1.0, %v1452_v13  ;;  %1167 = vmatpush.msra.mxu2 %v1127_v11  ;;  %v1124_v13 = vld [vmem:[%s1880_s8 + $0x28] sm:$0xff] }
0x1193   :  { %1453 = vrcp.f32 %v372_v12  ;;  %v384_v22 = vand.u32 2147483648, %v372_v12  ;;  %vm378_vm11 = vweird.f32 %v372_v12  ;;  %v382_v23 = vand.u32 2147483647, %v372_v12 }
0x1194   :  { %v668_v50 = vmul.f32 %v1448_v60, %v667_v45  ;;  %1455 = vrcp.f32 %v950_v14  ;;  %v962_v30 = vand.u32 2147483648, %v950_v14  ;;  %vm956_vm15 = vweird.f32 %v950_v14 }
0x1195   :  { %vm383_vm13 = vcmp.eq.f32.partialorder %v382_v23, 8.507059e+37  ;;  %v960_v31 = vand.u32 2147483647, %v950_v14  ;;  %v871_v1 = vpop.permute.xlu0 %870 }
0x1196   :  { %v669_v53 = vadd.f32 %v1448_v60, %v668_v50  ;;  %v963_v36 = vor.u32 1.1754944e-38, %v962_v30  ;;  %v873_v5 = vmul.f32 %v871_v1, %v1753_v34  ;;  %v1126_v34 = vld [vmem:[%s1880_s8 + $0x38] sm:$0xff] }
0x1197   :  { %584 = vrot.lane.b32.xlu1 %v581_v32, %s1491_s18  ;;  %vm961_vm3 = vcmp.eq.f32.partialorder %v960_v31, 8.507059e+37  ;;  %1168 = vmatpush.msra.mxu2 %v1126_v34 }
0x1198   :  { %v673_v56 = vsel %vm672_vm8, %v1448_v60, %v669_v53  ;;  %v1090_v6 = vrot.slane %v873_v5, 2  ;;  %vm1105_vm8 = vcmask 162816  }
0x1199   :  { %v678_v58 = vsel %vm675_vm9, %v677_v57, %v673_v56  ;;  %v1454_v15 = vpop.eup %1453  ;;  %vm1107_vm9 = vcmask 244736  }
0x119a   :  { %v374_v16 = vmul.f32 %v1454_v15, %v372_v12  ;;  %v1456_v18 = vpop.eup %1455  ;;  %vm379_vm10 = vweird.f32 %v1454_v15  ;;  %v1125_v12 = vld [vmem:[%s1880_s8 + $0x30] sm:$0xff] }
0x119b   :  { %v952_v7 = vmul.f32 %v1456_v18, %v950_v14  ;;  %vm380_vm12 = vmor %vm378_vm11, %vm379_vm10  ;;  %vm957_vm14 = vweird.f32 %v1456_v18  ;;  %1169 = vmatpush.msra.mxu2 %v1125_v12  ;;  %v1123_v14 = vld [vmem:[%s1880_s8 + $0x20] sm:$0xff]  ;;  %vm1109_vm10 = vcmask 326656   ;;  %vm1111_vm11 = vcmask 408576  }
0x119c   :  { %v375_v17 = vsub.f32 1.0, %v374_v16  ;;  %vm958_vm2 = vmor %vm956_vm15, %vm957_vm14  ;;  %v1121_v16 = vld [vmem:[%s1880_s8 + $0x10] sm:$0xff]  ;;  %vm1185_vm14 = vcmask 25600  }
0x119d   :  { %v953_v21 = vsub.f32 1.0, %v952_v7  ;;  %1170 = vmatpush.msra.mxu2 %v1124_v13  ;;  %v1130_v7 = vld [vmem:[%s1881_s9] sm:$0xff] }
0x119e   :  { %v376_v2 = vmul.f32 %v1454_v15, %v375_v17 }
0x119f   :  { %772 = vrot.lane.b32.xlu1 %v769_v52, %s1491_s18  ;;  %v954_v25 = vmul.f32 %v1456_v18, %v953_v21  ;;  %1171 = vmatpush.msra.mxu2 %v1123_v14 }
0x11a0   :  { %v377_v20 = vadd.f32 %v1454_v15, %v376_v2  ;;  %v1120_v2 = vld [vmem:[%s1880_s8 + $0x8] sm:$0xff] }
0x11a1   :  { %v955_v28 = vadd.f32 %v1456_v18, %v954_v25 }
0x11a2   :  { %v381_v24 = vsel %vm380_vm12, %v1454_v15, %v377_v20  ;;  %v1122_v15 = vld [vmem:[%s1880_s8 + $0x18] sm:$0xff]  ;;  %vm1113_vm12 = vcmask 490496  }
0x11a3   :  { %v959_v35 = vsel %vm958_vm2, %v1456_v18, %v955_v28  ;;  %1172 = vmatpush.msra.mxu2 %v1122_v15 }
0x11a5   :  { %1173 = vmatpush.msra.mxu2 %v1121_v16 }
0x11a7   :  { %681 = vrot.lane.b32.xlu1 %v678_v58, %s1491_s18  ;;  %v490_v58 = vmul.f32 %v488_v55, %v1693_v29  ;;  %v1131_v29 = vld [vmem:[%s1881_s9 + $0x8] sm:$0xff]  ;;  %1174 = vmatpush.msra.mxu2 %v1120_v2 }
0x11a8   :  { %1150 = vmatpush.msrb.mxu1 %v1131_v29 }
0x11a9   :  { %v1073_v61 = vrot.slane %v490_v58, 2 }
0x11aa   :  { %1151 = vmatpush.msrb.mxu1 %v1130_v7 }
0x1201   :  { %v1011_v19 = vpop.permute.xlu1 %1010 }
0x1202   :  { %v1801_v39 = vmul.f32 %v1011_v19, %v1778_v46  ;;  %v385_v46 = vor.u32 1.1754944e-38, %v384_v22 }
0x1204   :  { %v1015_v62 = vrot.slane %v1801_v39, 6  ;;  %v386_v33 = vsel %vm383_vm13, %v385_v46, %v381_v24  ;;  %vm1115_vm13 = vcmask 572416  }
0x1206   :  { %1016 = vrot.lane.b32.xlu2 %v1015_v62, %s1490_s17  ;;  %v1119_v62 = vld [vmem:[%s1880_s8] sm:$0xff] }
0x1207   :  { %1175 = vmatpush.msra.mxu2 %v1119_v62 }
0x1209   :  { %v585_v3 = vpop.permute.xlu1 %584 }
0x120a   :  { %v587_v40 = vmul.f32 %v585_v3, %v1708_v59  ;;  %v964_v59 = vsel %vm961_vm3, %v963_v36, %v959_v35 }
0x120c   :  { %v1078_v26 = vrot.slane %v587_v40, 4 }
0x120e   :  { %1079 = vrot.lane.b32.xlu1 %v1078_v26, %s1491_s18  ;;  %389 = vrot.lane.b32.xlu2 %v386_v33, %s1491_s18 }
0x1211   :  { %v773_v42 = vpop.permute.xlu1 %772 }
0x1212   :  { %v775_v10 = vmul.f32 %v773_v42, %v1741_v63 }
0x1216   :  { %967 = vrot.lane.b32.xlu2 %v964_v59, %s1491_s18 }
0x1219   :  { %v682_v20 = vpop.permute.xlu1 %681 }
0x121a   :  { %v684_v23 = vmul.f32 %v682_v20, %v1723_v27  ;;  %v1117_v27 = vld [vmem:[%s1878_s6] sm:$0x3] }
0x121c   :  { %v1083_v25 = vrot.slane %v684_v23, 6 }
0x1260   :  { %v1017_v60 = vpop.permute.xlu2 %1016 }
0x1261   :  { %1328 = vmatmul.msk.f32.vlgmr.msrb.gmra.mxu0 %vm273_vm1, %v1017_v60 }
0x1268   :  { %v390_v37 = vpop.permute.xlu2 %389 }
0x1269   :  { %v392_v41 = vmul.f32 %v390_v37, %v1678_v0 }
0x126b   :  { %1069 = vrot.lane.b32.xlu2 %v392_v41, %s1490_s17  ;;  %v1364_v41 = vld [vmem:[%s1882_s10] ss:$0 sm:$0xff] }
0x1270   :  { %v968_v9 = vpop.permute.xlu2 %967 }
0x1271   :  { %v970_v43 = vmul.f32 %v968_v9, %v1765_v4 }
0x1273   :  { %v1095_v32 = vrot.slane %v970_v43, 4  ;;  %1086 = vrot.lane.b32.xlu2 %v775_v10, %s1488_s5 }
0x1275   :  { %1096 = vrot.lane.b32.xlu1 %v1095_v32, %s1492_s19 }
0x1280   :  { %v1080_v40 = vpop.permute.xlu1 %1079 }
0x12c5   :  { %v1070_v21 = vpop.permute.xlu2 %1069 }
0x12cd   :  { %v1087_v46 = vpop.permute.xlu2 %1086 }
0x12de   :  { %v1037_v44 = vpop.f32.mrf.mxu0 }
0x12df   :  { %v1041_v45 = vrot.slane %v1037_v44, 2 }
0x12e1   :  { %v1043_v47 = vadd.f32 %v1041_v45, %v1732_v38 }
0x12e3   :  { %v1329_v48 = vmul.f32 -1.442695, %v1043_v47 }
0x12e5   :  { %1457 = vpow2.f32 %v1329_v48 }
0x12e7   :  { %v1097_v31 = vpop.permute.xlu1 %1096 }
0x12eb   :  { %v1458_v0 = vpop.eup %1457 }
0x12ec   :  { %v1047_v49 = vadd.f32 1.0, %v1458_v0 }
0x12ee   :  { %1459 = vrcp.f32 %v1047_v49  ;;  %v1059_v63 = vand.u32 2147483648, %v1047_v49  ;;  %v1057_v4 = vand.u32 2147483647, %v1047_v49  ;;  %vm1053_vm0 = vweird.f32 %v1047_v49 }
0x12f0   :  { %v1060_v56 = vor.u32 1.1754944e-38, %v1059_v63  ;;  %vm1058_vm6 = vcmp.eq.f32.partialorder %v1057_v4, 8.507059e+37 }
0x12f4   :  { %v1460_v50 = vpop.eup %1459 }
0x12f5   :  { %v1049_v51 = vmul.f32 %v1460_v50, %v1047_v49  ;;  %vm1054_vm4 = vweird.f32 %v1460_v50 }
0x12f6   :  { %vm1055_vm5 = vmor %vm1053_vm0, %vm1054_vm4 }
0x12f7   :  { %v1050_v52 = vsub.f32 1.0, %v1049_v51 }
0x12f9   :  { %v1051_v53 = vmul.f32 %v1460_v50, %v1050_v52 }
0x12fb   :  { %v1052_v54 = vadd.f32 %v1460_v50, %v1051_v53 }
0x12fd   :  { %v1056_v57 = vsel %vm1055_vm5, %v1460_v50, %v1052_v54 }
0x12fe   :  { %v1061_v38 = vsel %vm1058_vm6, %v1060_v56, %v1056_v57 }
0x12ff   :  { %1064 = vrot.lane.b32.xlu0 %v1061_v38, %s1491_s18 }
0x1307   :  { %1074 = vrot.lane.b32.xlu0 %v1073_v61, %s1487_s0 }
0x130f   :  { %1091 = vrot.lane.b32.xlu0 %v1090_v6, %s1489_s2 }
0x1371   :  { %v1065_v17 = vpop.permute.xlu0 %1064 }
0x1372   :  { %v1067_v18 = vmul.f32 %v1065_v17, %v1801_v39  ;;  %v1129_v39 = vld [vmem:[%s1879_s7] sm:$0x3] }
0x1373   :  { %1330 = vmatmul.msk.f32.vlgmr.msrb.gmra.mxu1 %vm1132_vm7, %v1129_v39 }
0x1374   :  { %v1100_v19 = vrot.slane %v1067_v18, 6 }
0x1376   :  { %1101 = vrot.lane.b32.xlu2 %v1100_v19, %s1493_s15 }
0x1379   :  { %v1075_v22 = vpop.permute.xlu0 %1074 }
0x137a   :  { %v1104_v3 = vsel %vm273_vm1, %v1070_v21, %v1075_v22  ;;  %vm1156_vm1 = vcmask 654336  }
0x137b   :  { %v1106_v24 = vsel %vm1105_vm8, %v1104_v3, %v1080_v40 }
0x137c   :  { %v1108_v26 = vsel %vm1107_vm9, %v1106_v24, %v1083_v25 }
0x137d   :  { %v1110_v28 = vsel %vm1109_vm10, %v1108_v26, %v1087_v46 }
0x1381   :  { %v1092_v33 = vpop.permute.xlu0 %1091 }
0x1382   :  { %v1112_v30 = vsel %vm1111_vm11, %v1110_v28, %v1092_v33 }
0x1383   :  { %v1114_v35 = vsel %vm1113_vm12, %v1112_v30, %v1097_v31 }
0x13d0   :  { %v1102_v36 = vpop.permute.xlu2 %1101 }
0x13d1   :  { %v1116_v59 = vsel %vm1115_vm13, %v1114_v35, %v1102_v36 }
0x13d2   :  { %v1118_v60 = vmul.f32 %v1117_v27, %v1116_v59 }
0x13d4   :  { %1331 = vmatmul.msk.f32.vlgmr.msra.gmra.mxu2 %vm1156_vm1, %v1118_v60 }
0x13f0   :  { %v1153_v37 = vpop.f32.mrf.mxu1 }
0x1457   :  { %v1177_v42 = vpop.f32.mrf.mxu2 }
0x1458   :  { %v1178_v9 = vadd.f32 %v1177_v42, %v1153_v37 }
0x145a   :  { %v1184_v10 = vadd.f32 %v1364_v41, %v1178_v9 }
0x145c   :  { %1186 = vst.msk [vmem:[#allocation2] sm:$0x3] %vm1185_vm14, %v1184_v10 }
0x145d   :  { %1197 = dma.vmem_to_hbm [thread:$0]  %s1193_s24, 32, %s1195_s4, [#allocation3]  }
0x145e   :  { %1485 = dma.done.wait [#allocation3], 32  }
0x145f   :  { %1486 = vsyncadd [#allocation3], 4294967264 }
0x1460   :  { %1202 = vsyncpa [#allocation3], 1 }

</bundles_post_ra>
